<compile_context>
chip_gen: v5e
topology: v5e:2x2
jax: 0.10.0
libtpu: 0.0.40
codegen_flags: <defaults>
</compile_context>

<pallas_src>
import math
from functools import partial

import jax
import jax.numpy as jnp
from jax.experimental import pallas as pl
from jax.experimental.pallas import tpu as pltpu

REF_PREC = jax.lax.Precision.HIGHEST   # only used by the pure-JAX reference


# ----------------------------- fused kernel -------------------------------- #

def decoder_layer_kernel(x0_ref, xsb_ref, enc_ref, wattn_ref, battn_ref,
                         ffn_ref, p_ref, o_ref, *,
                         batch, seq, d_model, ffn_dim, num_heads, head_dim,
                         eps):
    B, S, D, F, H = batch, seq, d_model, ffn_dim, num_heads

    x0 = x0_ref[...]            # (S, D)   batch element 0 of x
    x_sb = xsb_ref[...]         # (S*B, D) row s*B + b  <->  token (b, s)
    enc0 = enc_ref[...]         # (S, D)   batch element 0 of encoder output

    # Packed scalar-row params: [bo1, bo2, ln1_s, ln1_b, ln2_s, ln2_b,
    #                            ln3_s, ln3_b, ffn_b2], each a (1, D) row.
    p = p_ref[...]
    bo1, bo2 = p[0:1], p[1:2]
    ln1_s, ln1_b = p[2:3], p[3:4]
    ln2_s, ln2_b = p[4:5], p[5:6]
    ln3_s, ln3_b = p[6:7], p[7:8]
    fb2 = p[8:9]

    # Packed FFN weights: rows [0:D] = W1 (D,F); rows [D:D+F, :D] = W2 (F,D);
    # row D+F = b1 (F,).
    wf = ffn_ref[...]
    fw1 = wf[:D, :F]
    fw2 = wf[D:D + F, :D]
    fb1 = wf[D + F:D + F + 1, :F]

    def layernorm(y, scale, bias):
        # torch.std is unbiased (/(D-1)); the module divides by (std + eps).
        mean = jnp.mean(y, axis=-1, keepdims=True)
        var = jnp.sum((y - mean) ** 2, axis=-1, keepdims=True) * (1.0 / (D - 1))
        inv = pl.reciprocal(jnp.sqrt(var) + eps, approx=True)   # EUP, not VALU
        return scale * ((y - mean) * inv) + bias

    def mha_batch0(q, k, v, wq, bq, wk, bk, wv, bv, wo, bo):
        # q/k/v: (T, D).  Projection weights are head-major (H, hd, D), q/k/v
        # biases are (H, hd), output weight is (H, hd, D), output bias (1, D).
        # Every matmul is a leading-batch, canonical-contraction einsum: no
        # lane slicing, no transposes, no concat over heads inside the kernel.
        def proj(t, w, b):                       # -> (H, T, hd)
            tb = jnp.broadcast_to(t[None], (H,) + t.shape)
            return (jnp.einsum('htd,hed->hte', tb, w,
                               preferred_element_type=jnp.float32)
                    + b[:, None, :])

        Qh = proj(q, wq, bq) * (1.0 / math.sqrt(head_dim))
        Kh = proj(k, wk, bk)
        Vh = proj(v, wv, bv)

        logits = jnp.einsum('hqe,hke->hqk', Qh, Kh,
                            preferred_element_type=jnp.float32)   # (H, Tq, Tk)
        mx = jnp.max(logits, axis=-1, keepdims=True)
        ex = jnp.exp(logits - mx)
        attn = ex * pl.reciprocal(jnp.sum(ex, axis=-1, keepdims=True),
                                  approx=True)
        ctx = jnp.einsum('hqk,hke->hqe', attn, Vh,
                         preferred_element_type=jnp.float32)      # (H, Tq, hd)
        outh = jnp.einsum('hqe,hed->hqd', ctx, wo,
                          preferred_element_type=jnp.float32)     # (H, Tq, D)
        return jnp.sum(outh, axis=0) + bo                          # (Tq, D)

    # Sublayer 1: masked self-attention.  Only mha(...)[0] is consumed
    # downstream, so only the batch-0 attention path is computed.
    x2_0 = layernorm(x0, ln1_s, ln1_b)
    mha1_0 = mha_batch0(x2_0, x2_0, x0,
                        wattn_ref[0], battn_ref[0],
                        wattn_ref[1], battn_ref[1],
                        wattn_ref[2], battn_ref[2],
                        wattn_ref[3], bo1)

    # Sublayer 2: cross-attention against encoder batch 0 (only enc[0] DMA'd).
    s1_0 = layernorm(x0 + mha1_0, ln2_s, ln2_b)
    mha2_0 = mha_batch0(s1_0, enc0, enc0,
                        wattn_ref[4], battn_ref[3],
                        wattn_ref[5], battn_ref[4],
                        wattn_ref[6], battn_ref[5],
                        wattn_ref[7], bo2)

    # Sublayer 3: broadcast-add the batch-0 attention output to every batch row
    # (PyTorch `x + mha(...)[0]` quirk), LN3, position-wise FFN on the
    # (S*B, D) token slab (s-major, b-minor row order).
    mha2_rep = jnp.broadcast_to(mha2_0[:, None, :], (S, B, D)).reshape(S * B, D)
    s2 = layernorm(x_sb + mha2_rep, ln3_s, ln3_b)                  # (S*B, D)
    hmid = jnp.maximum(
        jnp.dot(s2, fw1, preferred_element_type=jnp.float32) + fb1, 0.0)
    res = s2 + jnp.dot(hmid, fw2, preferred_element_type=jnp.float32) + fb2

    # Lane-dense store: assemble a (B, S*D) slab (last dim multiple of 128 ->
    # unmasked full-lane stores).  With (s-major, b-minor) row order the lane
    # block for sequence position s is exactly the contiguous rows
    # res[s*B:(s+1)*B, :], so the assembly is static sublane slices + one lane
    # concat (no generic reshape relayout needed).
    o_ref[...] = jnp.concatenate(
        [res[s * B:(s + 1) * B, :] for s in range(S)], axis=1)


# ----------------------------- wrapper -------------------------------------- #

def decoder_layer_forward(x, encoder_output, params, num_heads, eps=1e-6):
    B, S, D = x.shape
    H = num_heads
    hd = D // H
    F = params['ffn_w1'].shape[1]
    W = max(D, F)

    def head_major(w):           # (D_in, D_out) -> (H, hd, D_in)
        return jnp.transpose(w).reshape(H, hd, D)

    (wq1, bq1, wk1, bk1, wv1, bv1, wo1, bo1) = params['mha1']
    (wq2, bq2, wk2, bk2, wv2, bv2, wo2, bo2) = params['mha2']

    # --- operand packing (27 inputs -> 7 DMAs) -------------------------------
    w_attn = jnp.stack([head_major(wq1), head_major(wk1), head_major(wv1),
                        wo1.reshape(H, hd, D),
                        head_major(wq2), head_major(wk2), head_major(wv2),
                        wo2.reshape(H, hd, D)])          # (8, H, hd, D)
    b_attn = jnp.stack([bq1.reshape(H, hd), bk1.reshape(H, hd),
                        bv1.reshape(H, hd),
                        bq2.reshape(H, hd), bk2.reshape(H, hd),
                        bv2.reshape(H, hd)])             # (6, H, hd)

    ffn_pack = jnp.zeros((D + F + 1, W), jnp.float32)
    ffn_pack = ffn_pack.at[:D, :F].set(params['ffn_w1'])
    ffn_pack = ffn_pack.at[D:D + F, :D].set(params['ffn_w2'])
    ffn_pack = ffn_pack.at[D + F, :F].set(params['ffn_b1'])

    p_slab = jnp.stack([bo1, bo2,
                        params['ln1_scale'], params['ln1_bias'],
                        params['ln2_scale'], params['ln2_bias'],
                        params['ln3_scale'], params['ln3_bias'],
                        params['ffn_b2']])               # (9, D)

    x0 = x[0]                                            # (S, D) attn path
    x_sb = jnp.transpose(x, (1, 0, 2)).reshape(S * B, D)  # (S*B, D), s-major
    enc0 = encoder_output[0]                             # only batch 0 is used

    vmem = pl.BlockSpec(memory_space=pltpu.MemorySpace.VMEM)
    out_flat = pl.pallas_call(
        partial(decoder_layer_kernel, batch=B, seq=S, d_model=D, ffn_dim=F,
                num_heads=H, head_dim=hd, eps=eps),
        out_shape=jax.ShapeDtypeStruct((B, S * D), x.dtype),   # lane-dense
        in_specs=[vmem] * 7,
        out_specs=vmem,
    )(x0, x_sb, enc0, w_attn, b_attn, ffn_pack, p_slab)
    return out_flat.reshape(B, S, D)


# ----------------------------- pure-JAX reference -------------------------- #

def ref_layernorm(x, scale, bias, eps):
    d = x.shape[-1]
    mean = jnp.mean(x, -1, keepdims=True)
    var = jnp.sum((x - mean) ** 2, -1, keepdims=True) / (d - 1)
    return scale * ((x - mean) / (jnp.sqrt(var) + eps)) + bias


def ref_mha(q, k, v, p, num_heads):
    wq, bq, wk, bk, wv, bv, wo, bo = p
    B, S, D = q.shape
    hd = D // num_heads
    Q = (jnp.einsum('bsd,de->bse', q, wq, precision=REF_PREC) + bq).reshape(B, S, num_heads, hd)
    K = (jnp.einsum('bsd,de->bse', k, wk, precision=REF_PREC) + bk).reshape(B, S, num_heads, hd)
    V = (jnp.einsum('bsd,de->bse', v, wv, precision=REF_PREC) + bv).reshape(B, S, num_heads, hd)
    logits = jnp.einsum('bqhd,bkhd->bhqk', Q, K, precision=REF_PREC) / math.sqrt(hd)
    attn = jax.nn.softmax(logits, axis=-1)
    ctx = jnp.einsum('bhqk,bkhd->bqhd', attn, V, precision=REF_PREC).reshape(B, S, D)
    return jnp.einsum('bsd,de->bse', ctx, wo, precision=REF_PREC) + bo


def ref_decoder(x, enc, params, num_heads, eps=1e-6):
    x2 = ref_layernorm(x, params['ln1_scale'], params['ln1_bias'], eps)
    mha1 = ref_mha(x2, x2, x, params['mha1'], num_heads)
    s1 = ref_layernorm(x + mha1[0], params['ln2_scale'], params['ln2_bias'], eps)
    mha2 = ref_mha(s1, enc, enc, params['mha2'], num_heads)
    s2 = ref_layernorm(x + mha2[0], params['ln3_scale'], params['ln3_bias'], eps)
    h = jnp.maximum(jnp.einsum('bsd,df->bsf', s2, params['ffn_w1'], precision=REF_PREC)
                    + params['ffn_b1'], 0.0)
    ffn = jnp.einsum('bsf,fd->bsd', h, params['ffn_w2'], precision=REF_PREC) + params['ffn_b2']
    return s2 + ffn


# ----------------------------- setup / main --------------------------------- #

def make_params(key, d_model, ffn_dim):
    ks = jax.random.split(key, 32)
    it = iter(ks)

    def lin(din, dout, scale=0.05):
        w = scale * jax.random.normal(next(it), (din, dout), jnp.float32)
        b = scale * jax.random.normal(next(it), (dout,), jnp.float32)
        return w, b

    def mha_params():
        wq, bq = lin(d_model, d_model)
        wk, bk = lin(d_model, d_model)
        wv, bv = lin(d_model, d_model)
        wo, bo = lin(d_model, d_model)
        return (wq, bq, wk, bk, wv, bv, wo, bo)

    params = {'mha1': mha_params(), 'mha2': mha_params()}
    params['ffn_w1'], params['ffn_b1'] = lin(d_model, ffn_dim)
    params['ffn_w2'], params['ffn_b2'] = lin(ffn_dim, d_model)
    for name in ('ln1', 'ln2', 'ln3'):
        params[f'{name}_scale'] = 1.0 + 0.1 * jax.random.normal(next(it), (d_model,), jnp.float32)
        params[f'{name}_bias'] = 0.1 * jax.random.normal(next(it), (d_model,), jnp.float32)
    return params


if __name__ == "__main__":
    B, S, D, H, FFN = 2, 8, 32, 4, 64
    key = jax.random.PRNGKey(0)
    kx, ke, kp = jax.random.split(key, 3)
    x = jax.random.normal(kx, (B, S, D), jnp.float32)
    encoder_output = jax.random.normal(ke, (B, S, D), jnp.float32)
    params = make_params(kp, D, FFN)

    fwd = jax.jit(partial(decoder_layer_forward, num_heads=H, eps=1e-6))
    out = jax.block_until_ready(fwd(x, encoder_output, params))

    ref = ref_decoder(x, encoder_output, params, num_heads=H, eps=1e-6)
    max_err = float(jnp.max(jnp.abs(out - ref)))

    # Kernel matmuls run at DEFAULT MXU precision (bf16 passes) and the
    # softmax / LayerNorm divisors use EUP approximate reciprocals, while the
    # reference uses exact f32 HIGHEST -> allow up to 1e-2 drift on O(1)
    # outputs (typically a few e-3 is observed).
    ok = (out.shape == (B, S, D)
          and bool(jnp.all(jnp.isfinite(out)))
          and max_err < 1e-2)
    if ok:
        print("KERNEL_OK")
    else:
        print(f"MISMATCH shape={out.shape} max_err={max_err}")
</pallas_src>

<mosaic_0001>
module attributes {stable_mosaic.version = 11 : i64} {
  func.func @decoder_layer_kernel(%arg0: memref<8x32xf32, #tpu.memory_space<vmem>>, %arg1: memref<16x32xf32, #tpu.memory_space<vmem>>, %arg2: memref<8x32xf32, #tpu.memory_space<vmem>>, %arg3: memref<8x4x8x32xf32, #tpu.memory_space<vmem>>, %arg4: memref<6x4x8xf32, #tpu.memory_space<vmem>>, %arg5: memref<97x64xf32, #tpu.memory_space<vmem>>, %arg6: memref<9x32xf32, #tpu.memory_space<vmem>>, %arg7: memref<2x256xf32, #tpu.memory_space<vmem>>) attributes {dimension_semantics = [], scalar_prefetch = 0 : i64, scratch_operands = 0 : i64, tpu.core_type = #tpu.core_type<tc>} {
    %c0 = arith.constant 0 : index
    %c0_0 = arith.constant 0 : index
    %0 = vector.load %arg0[%c0, %c0_0] : memref<8x32xf32, #tpu.memory_space<vmem>>, vector<8x32xf32>
    %c0_1 = arith.constant 0 : index
    %c0_2 = arith.constant 0 : index
    %1 = vector.load %arg1[%c0_1, %c0_2] : memref<16x32xf32, #tpu.memory_space<vmem>>, vector<16x32xf32>
    %c0_3 = arith.constant 0 : index
    %c0_4 = arith.constant 0 : index
    %2 = vector.load %arg2[%c0_3, %c0_4] : memref<8x32xf32, #tpu.memory_space<vmem>>, vector<8x32xf32>
    %c0_5 = arith.constant 0 : index
    %c0_6 = arith.constant 0 : index
    %3 = vector.load %arg6[%c0_5, %c0_6] : memref<9x32xf32, #tpu.memory_space<vmem>>, vector<9x32xf32>
    %4 = vector.extract_strided_slice %3 {offsets = [0, 0], sizes = [1, 32], strides = [1, 1]} : vector<9x32xf32> to vector<1x32xf32>
    %5 = vector.extract_strided_slice %3 {offsets = [1, 0], sizes = [1, 32], strides = [1, 1]} : vector<9x32xf32> to vector<1x32xf32>
    %6 = vector.extract_strided_slice %3 {offsets = [2, 0], sizes = [1, 32], strides = [1, 1]} : vector<9x32xf32> to vector<1x32xf32>
    %7 = vector.extract_strided_slice %3 {offsets = [3, 0], sizes = [1, 32], strides = [1, 1]} : vector<9x32xf32> to vector<1x32xf32>
    %8 = vector.extract_strided_slice %3 {offsets = [4, 0], sizes = [1, 32], strides = [1, 1]} : vector<9x32xf32> to vector<1x32xf32>
    %9 = vector.extract_strided_slice %3 {offsets = [5, 0], sizes = [1, 32], strides = [1, 1]} : vector<9x32xf32> to vector<1x32xf32>
    %10 = vector.extract_strided_slice %3 {offsets = [6, 0], sizes = [1, 32], strides = [1, 1]} : vector<9x32xf32> to vector<1x32xf32>
    %11 = vector.extract_strided_slice %3 {offsets = [7, 0], sizes = [1, 32], strides = [1, 1]} : vector<9x32xf32> to vector<1x32xf32>
    %12 = vector.extract_strided_slice %3 {offsets = [8, 0], sizes = [1, 32], strides = [1, 1]} : vector<9x32xf32> to vector<1x32xf32>
    %c0_7 = arith.constant 0 : index
    %c0_8 = arith.constant 0 : index
    %13 = vector.load %arg5[%c0_7, %c0_8] : memref<97x64xf32, #tpu.memory_space<vmem>>, vector<97x64xf32>
    %14 = vector.extract_strided_slice %13 {offsets = [0, 0], sizes = [32, 64], strides = [1, 1]} : vector<97x64xf32> to vector<32x64xf32>
    %15 = vector.extract_strided_slice %13 {offsets = [32, 0], sizes = [64, 32], strides = [1, 1]} : vector<97x64xf32> to vector<64x32xf32>
    %16 = vector.extract_strided_slice %13 {offsets = [96, 0], sizes = [1, 64], strides = [1, 1]} : vector<97x64xf32> to vector<1x64xf32>
    %cst = arith.constant dense<0.000000e+00> : vector<8xf32>
    %17 = vector.multi_reduction <add>, %0, %cst [1] : vector<8x32xf32> to vector<8xf32>
    %18 = vector.shape_cast %17 : vector<8xf32> to vector<8x1xf32>
    %cst_9 = arith.constant 3.200000e+01 : f32
    %19 = vector.broadcast %cst_9 : f32 to vector<8x1xf32>
    %20 = arith.divf %18, %19 : vector<8x1xf32>
    %21 = vector.broadcast %20 : vector<8x1xf32> to vector<8x32xf32>
    %22 = arith.subf %0, %21 : vector<8x32xf32>
    %23 = arith.mulf %22, %22 : vector<8x32xf32>
    %cst_10 = arith.constant dense<0.000000e+00> : vector<8xf32>
    %24 = vector.multi_reduction <add>, %23, %cst_10 [1] : vector<8x32xf32> to vector<8xf32>
    %25 = vector.shape_cast %24 : vector<8xf32> to vector<8x1xf32>
    %cst_11 = arith.constant 0.0322580636 : f32
    %26 = vector.broadcast %cst_11 : f32 to vector<8x1xf32>
    %27 = arith.mulf %25, %26 : vector<8x1xf32>
    %28 = math.sqrt %27 : vector<8x1xf32>
    %cst_12 = arith.constant 9.99999997E-7 : f32
    %29 = vector.broadcast %cst_12 : f32 to vector<8x1xf32>
    %30 = arith.addf %28, %29 : vector<8x1xf32>
    %31 = tpu.reciprocal %30 {approx = true} : vector<8x1xf32> -> vector<8x1xf32>
    %32 = vector.broadcast %20 : vector<8x1xf32> to vector<8x32xf32>
    %33 = arith.subf %0, %32 : vector<8x32xf32>
    %34 = vector.broadcast %31 : vector<8x1xf32> to vector<8x32xf32>
    %35 = arith.mulf %33, %34 : vector<8x32xf32>
    %36 = vector.broadcast %6 : vector<1x32xf32> to vector<8x32xf32>
    %37 = arith.mulf %36, %35 : vector<8x32xf32>
    %38 = vector.broadcast %7 : vector<1x32xf32> to vector<8x32xf32>
    %39 = arith.addf %37, %38 : vector<8x32xf32>
    %c0_13 = arith.constant 0 : index
    %c0_14 = arith.constant 0 : index
    %c0_15 = arith.constant 0 : index
    %c0_16 = arith.constant 0 : index
    %40 = vector.load %arg3[%c0_13, %c0_14, %c0_15, %c0_16] : memref<8x4x8x32xf32, #tpu.memory_space<vmem>>, vector<1x4x8x32xf32>
    %41 = vector.shape_cast %40 : vector<1x4x8x32xf32> to vector<4x8x32xf32>
    %c0_17 = arith.constant 0 : index
    %c0_18 = arith.constant 0 : index
    %c0_19 = arith.constant 0 : index
    %42 = vector.load %arg4[%c0_17, %c0_18, %c0_19] : memref<6x4x8xf32, #tpu.memory_space<vmem>>, vector<1x4x8xf32>
    %43 = vector.shape_cast %42 : vector<1x4x8xf32> to vector<4x8xf32>
    %c1 = arith.constant 1 : index
    %c0_20 = arith.constant 0 : index
    %c0_21 = arith.constant 0 : index
    %c0_22 = arith.constant 0 : index
    %44 = vector.load %arg3[%c1, %c0_20, %c0_21, %c0_22] : memref<8x4x8x32xf32, #tpu.memory_space<vmem>>, vector<1x4x8x32xf32>
    %45 = vector.shape_cast %44 : vector<1x4x8x32xf32> to vector<4x8x32xf32>
    %c1_23 = arith.constant 1 : index
    %c0_24 = arith.constant 0 : index
    %c0_25 = arith.constant 0 : index
    %46 = vector.load %arg4[%c1_23, %c0_24, %c0_25] : memref<6x4x8xf32, #tpu.memory_space<vmem>>, vector<1x4x8xf32>
    %47 = vector.shape_cast %46 : vector<1x4x8xf32> to vector<4x8xf32>
    %c2 = arith.constant 2 : index
    %c0_26 = arith.constant 0 : index
    %c0_27 = arith.constant 0 : index
    %c0_28 = arith.constant 0 : index
    %48 = vector.load %arg3[%c2, %c0_26, %c0_27, %c0_28] : memref<8x4x8x32xf32, #tpu.memory_space<vmem>>, vector<1x4x8x32xf32>
    %49 = vector.shape_cast %48 : vector<1x4x8x32xf32> to vector<4x8x32xf32>
    %c2_29 = arith.constant 2 : index
    %c0_30 = arith.constant 0 : index
    %c0_31 = arith.constant 0 : index
    %50 = vector.load %arg4[%c2_29, %c0_30, %c0_31] : memref<6x4x8xf32, #tpu.memory_space<vmem>>, vector<1x4x8xf32>
    %51 = vector.shape_cast %50 : vector<1x4x8xf32> to vector<4x8xf32>
    %c3 = arith.constant 3 : index
    %c0_32 = arith.constant 0 : index
    %c0_33 = arith.constant 0 : index
    %c0_34 = arith.constant 0 : index
    %52 = vector.load %arg3[%c3, %c0_32, %c0_33, %c0_34] : memref<8x4x8x32xf32, #tpu.memory_space<vmem>>, vector<1x4x8x32xf32>
    %53 = vector.shape_cast %52 : vector<1x4x8x32xf32> to vector<4x8x32xf32>
    %54 = vector.shape_cast %39 : vector<8x32xf32> to vector<1x8x32xf32>
    %55 = vector.shape_cast %54 : vector<1x8x32xf32> to vector<1x8x32xf32>
    %56 = vector.broadcast %55 : vector<1x8x32xf32> to vector<4x8x32xf32>
    "tpu.trace_start"() <{level = 10 : i32, message = "htd,hed->hte"}> : () -> ()
    %cst_35 = arith.constant dense<0.000000e+00> : vector<4x8x8xf32>
    %57 = tpu.matmul %56, %41, %cst_35 {dimension_numbers = #tpu.dot_dimension_numbers<[2], [2], [1], [1], [0, 0, 0, 1, 1, 1], [0], [0]>} : vector<4x8x32xf32>, vector<4x8x32xf32>, vector<4x8x8xf32> -> vector<4x8x8xf32>
    "tpu.trace_stop"() : () -> ()
    %58 = vector.shape_cast %43 : vector<4x8xf32> to vector<4x1x8xf32>
    %59 = vector.broadcast %58 : vector<4x1x8xf32> to vector<4x8x8xf32>
    %60 = arith.addf %57, %59 : vector<4x8x8xf32>
    %cst_36 = arith.constant 0.353553385 : f32
    %61 = vector.broadcast %cst_36 : f32 to vector<4x8x8xf32>
    %62 = arith.mulf %60, %61 : vector<4x8x8xf32>
    %63 = vector.shape_cast %39 : vector<8x32xf32> to vector<1x8x32xf32>
    %64 = vector.shape_cast %63 : vector<1x8x32xf32> to vector<1x8x32xf32>
    %65 = vector.broadcast %64 : vector<1x8x32xf32> to vector<4x8x32xf32>
    "tpu.trace_start"() <{level = 10 : i32, message = "htd,hed->hte"}> : () -> ()
    %cst_37 = arith.constant dense<0.000000e+00> : vector<4x8x8xf32>
    %66 = tpu.matmul %65, %45, %cst_37 {dimension_numbers = #tpu.dot_dimension_numbers<[2], [2], [1], [1], [0, 0, 0, 1, 1, 1], [0], [0]>} : vector<4x8x32xf32>, vector<4x8x32xf32>, vector<4x8x8xf32> -> vector<4x8x8xf32>
    "tpu.trace_stop"() : () -> ()
    %67 = vector.shape_cast %47 : vector<4x8xf32> to vector<4x1x8xf32>
    %68 = vector.broadcast %67 : vector<4x1x8xf32> to vector<4x8x8xf32>
    %69 = arith.addf %66, %68 : vector<4x8x8xf32>
    %70 = vector.shape_cast %0 : vector<8x32xf32> to vector<1x8x32xf32>
    %71 = vector.shape_cast %70 : vector<1x8x32xf32> to vector<1x8x32xf32>
    %72 = vector.broadcast %71 : vector<1x8x32xf32> to vector<4x8x32xf32>
    "tpu.trace_start"() <{level = 10 : i32, message = "htd,hed->hte"}> : () -> ()
    %cst_38 = arith.constant dense<0.000000e+00> : vector<4x8x8xf32>
    %73 = tpu.matmul %72, %49, %cst_38 {dimension_numbers = #tpu.dot_dimension_numbers<[2], [2], [1], [1], [0, 0, 0, 1, 1, 1], [0], [0]>} : vector<4x8x32xf32>, vector<4x8x32xf32>, vector<4x8x8xf32> -> vector<4x8x8xf32>
    "tpu.trace_stop"() : () -> ()
    %74 = vector.shape_cast %51 : vector<4x8xf32> to vector<4x1x8xf32>
    %75 = vector.broadcast %74 : vector<4x1x8xf32> to vector<4x8x8xf32>
    %76 = arith.addf %73, %75 : vector<4x8x8xf32>
    "tpu.trace_start"() <{level = 10 : i32, message = "hqe,hke->hqk"}> : () -> ()
    %cst_39 = arith.constant dense<0.000000e+00> : vector<4x8x8xf32>
    %77 = tpu.matmul %62, %69, %cst_39 {dimension_numbers = #tpu.dot_dimension_numbers<[2], [2], [1], [1], [0, 0, 0, 1, 1, 1], [0], [0]>} : vector<4x8x8xf32>, vector<4x8x8xf32>, vector<4x8x8xf32> -> vector<4x8x8xf32>
    "tpu.trace_stop"() : () -> ()
    %cst_40 = arith.constant dense<0xFF800000> : vector<4x8xf32>
    %78 = vector.multi_reduction <maximumf>, %77, %cst_40 [2] : vector<4x8x8xf32> to vector<4x8xf32>
    %79 = vector.shape_cast %78 : vector<4x8xf32> to vector<4x8x1xf32>
    %80 = vector.broadcast %79 : vector<4x8x1xf32> to vector<4x8x8xf32>
    %81 = arith.subf %77, %80 : vector<4x8x8xf32>
    %82 = math.exp %81 : vector<4x8x8xf32>
    %cst_41 = arith.constant dense<0.000000e+00> : vector<4x8xf32>
    %83 = vector.multi_reduction <add>, %82, %cst_41 [2] : vector<4x8x8xf32> to vector<4x8xf32>
    %84 = vector.shape_cast %83 : vector<4x8xf32> to vector<4x8x1xf32>
    %85 = tpu.reciprocal %84 {approx = true} : vector<4x8x1xf32> -> vector<4x8x1xf32>
    %86 = vector.broadcast %85 : vector<4x8x1xf32> to vector<4x8x8xf32>
    %87 = arith.mulf %82, %86 : vector<4x8x8xf32>
    "tpu.trace_start"() <{level = 10 : i32, message = "hqk,hke->hqe"}> : () -> ()
    %cst_42 = arith.constant dense<0.000000e+00> : vector<4x8x8xf32>
    %88 = tpu.matmul %87, %76, %cst_42 {dimension_numbers = #tpu.dot_dimension_numbers<[2], [1], [1], [2], [0, 0, 0, 1, 1, 2], [0], [0]>} : vector<4x8x8xf32>, vector<4x8x8xf32>, vector<4x8x8xf32> -> vector<4x8x8xf32>
    "tpu.trace_stop"() : () -> ()
    "tpu.trace_start"() <{level = 10 : i32, message = "hqe,hed->hqd"}> : () -> ()
    %cst_43 = arith.constant dense<0.000000e+00> : vector<4x8x32xf32>
    %89 = tpu.matmul %88, %53, %cst_43 {dimension_numbers = #tpu.dot_dimension_numbers<[2], [1], [1], [2], [0, 0, 0, 1, 1, 2], [0], [0]>} : vector<4x8x8xf32>, vector<4x8x32xf32>, vector<4x8x32xf32> -> vector<4x8x32xf32>
    "tpu.trace_stop"() : () -> ()
    %cst_44 = arith.constant dense<0.000000e+00> : vector<8x32xf32>
    %90 = vector.multi_reduction <add>, %89, %cst_44 [0] : vector<4x8x32xf32> to vector<8x32xf32>
    %91 = vector.broadcast %4 : vector<1x32xf32> to vector<8x32xf32>
    %92 = arith.addf %90, %91 : vector<8x32xf32>
    %93 = arith.addf %0, %92 : vector<8x32xf32>
    %cst_45 = arith.constant dense<0.000000e+00> : vector<8xf32>
    %94 = vector.multi_reduction <add>, %93, %cst_45 [1] : vector<8x32xf32> to vector<8xf32>
    %95 = vector.shape_cast %94 : vector<8xf32> to vector<8x1xf32>
    %cst_46 = arith.constant 3.200000e+01 : f32
    %96 = vector.broadcast %cst_46 : f32 to vector<8x1xf32>
    %97 = arith.divf %95, %96 : vector<8x1xf32>
    %98 = vector.broadcast %97 : vector<8x1xf32> to vector<8x32xf32>
    %99 = arith.subf %93, %98 : vector<8x32xf32>
    %100 = arith.mulf %99, %99 : vector<8x32xf32>
    %cst_47 = arith.constant dense<0.000000e+00> : vector<8xf32>
    %101 = vector.multi_reduction <add>, %100, %cst_47 [1] : vector<8x32xf32> to vector<8xf32>
    %102 = vector.shape_cast %101 : vector<8xf32> to vector<8x1xf32>
    %cst_48 = arith.constant 0.0322580636 : f32
    %103 = vector.broadcast %cst_48 : f32 to vector<8x1xf32>
    %104 = arith.mulf %102, %103 : vector<8x1xf32>
    %105 = math.sqrt %104 : vector<8x1xf32>
    %cst_49 = arith.constant 9.99999997E-7 : f32
    %106 = vector.broadcast %cst_49 : f32 to vector<8x1xf32>
    %107 = arith.addf %105, %106 : vector<8x1xf32>
    %108 = tpu.reciprocal %107 {approx = true} : vector<8x1xf32> -> vector<8x1xf32>
    %109 = vector.broadcast %97 : vector<8x1xf32> to vector<8x32xf32>
    %110 = arith.subf %93, %109 : vector<8x32xf32>
    %111 = vector.broadcast %108 : vector<8x1xf32> to vector<8x32xf32>
    %112 = arith.mulf %110, %111 : vector<8x32xf32>
    %113 = vector.broadcast %8 : vector<1x32xf32> to vector<8x32xf32>
    %114 = arith.mulf %113, %112 : vector<8x32xf32>
    %115 = vector.broadcast %9 : vector<1x32xf32> to vector<8x32xf32>
    %116 = arith.addf %114, %115 : vector<8x32xf32>
    %c4 = arith.constant 4 : index
    %c0_50 = arith.constant 0 : index
    %c0_51 = arith.constant 0 : index
    %c0_52 = arith.constant 0 : index
    %117 = vector.load %arg3[%c4, %c0_50, %c0_51, %c0_52] : memref<8x4x8x32xf32, #tpu.memory_space<vmem>>, vector<1x4x8x32xf32>
    %118 = vector.shape_cast %117 : vector<1x4x8x32xf32> to vector<4x8x32xf32>
    %c3_53 = arith.constant 3 : index
    %c0_54 = arith.constant 0 : index
    %c0_55 = arith.constant 0 : index
    %119 = vector.load %arg4[%c3_53, %c0_54, %c0_55] : memref<6x4x8xf32, #tpu.memory_space<vmem>>, vector<1x4x8xf32>
    %120 = vector.shape_cast %119 : vector<1x4x8xf32> to vector<4x8xf32>
    %c5 = arith.constant 5 : index
    %c0_56 = arith.constant 0 : index
    %c0_57 = arith.constant 0 : index
    %c0_58 = arith.constant 0 : index
    %121 = vector.load %arg3[%c5, %c0_56, %c0_57, %c0_58] : memref<8x4x8x32xf32, #tpu.memory_space<vmem>>, vector<1x4x8x32xf32>
    %122 = vector.shape_cast %121 : vector<1x4x8x32xf32> to vector<4x8x32xf32>
    %c4_59 = arith.constant 4 : index
    %c0_60 = arith.constant 0 : index
    %c0_61 = arith.constant 0 : index
    %123 = vector.load %arg4[%c4_59, %c0_60, %c0_61] : memref<6x4x8xf32, #tpu.memory_space<vmem>>, vector<1x4x8xf32>
    %124 = vector.shape_cast %123 : vector<1x4x8xf32> to vector<4x8xf32>
    %c6 = arith.constant 6 : index
    %c0_62 = arith.constant 0 : index
    %c0_63 = arith.constant 0 : index
    %c0_64 = arith.constant 0 : index
    %125 = vector.load %arg3[%c6, %c0_62, %c0_63, %c0_64] : memref<8x4x8x32xf32, #tpu.memory_space<vmem>>, vector<1x4x8x32xf32>
    %126 = vector.shape_cast %125 : vector<1x4x8x32xf32> to vector<4x8x32xf32>
    %c5_65 = arith.constant 5 : index
    %c0_66 = arith.constant 0 : index
    %c0_67 = arith.constant 0 : index
    %127 = vector.load %arg4[%c5_65, %c0_66, %c0_67] : memref<6x4x8xf32, #tpu.memory_space<vmem>>, vector<1x4x8xf32>
    %128 = vector.shape_cast %127 : vector<1x4x8xf32> to vector<4x8xf32>
    %c7 = arith.constant 7 : index
    %c0_68 = arith.constant 0 : index
    %c0_69 = arith.constant 0 : index
    %c0_70 = arith.constant 0 : index
    %129 = vector.load %arg3[%c7, %c0_68, %c0_69, %c0_70] : memref<8x4x8x32xf32, #tpu.memory_space<vmem>>, vector<1x4x8x32xf32>
    %130 = vector.shape_cast %129 : vector<1x4x8x32xf32> to vector<4x8x32xf32>
    %131 = vector.shape_cast %116 : vector<8x32xf32> to vector<1x8x32xf32>
    %132 = vector.shape_cast %131 : vector<1x8x32xf32> to vector<1x8x32xf32>
    %133 = vector.broadcast %132 : vector<1x8x32xf32> to vector<4x8x32xf32>
    "tpu.trace_start"() <{level = 10 : i32, message = "htd,hed->hte"}> : () -> ()
    %cst_71 = arith.constant dense<0.000000e+00> : vector<4x8x8xf32>
    %134 = tpu.matmul %133, %118, %cst_71 {dimension_numbers = #tpu.dot_dimension_numbers<[2], [2], [1], [1], [0, 0, 0, 1, 1, 1], [0], [0]>} : vector<4x8x32xf32>, vector<4x8x32xf32>, vector<4x8x8xf32> -> vector<4x8x8xf32>
    "tpu.trace_stop"() : () -> ()
    %135 = vector.shape_cast %120 : vector<4x8xf32> to vector<4x1x8xf32>
    %136 = vector.broadcast %135 : vector<4x1x8xf32> to vector<4x8x8xf32>
    %137 = arith.addf %134, %136 : vector<4x8x8xf32>
    %cst_72 = arith.constant 0.353553385 : f32
    %138 = vector.broadcast %cst_72 : f32 to vector<4x8x8xf32>
    %139 = arith.mulf %137, %138 : vector<4x8x8xf32>
    %140 = vector.shape_cast %2 : vector<8x32xf32> to vector<1x8x32xf32>
    %141 = vector.shape_cast %140 : vector<1x8x32xf32> to vector<1x8x32xf32>
    %142 = vector.broadcast %141 : vector<1x8x32xf32> to vector<4x8x32xf32>
    "tpu.trace_start"() <{level = 10 : i32, message = "htd,hed->hte"}> : () -> ()
    %cst_73 = arith.constant dense<0.000000e+00> : vector<4x8x8xf32>
    %143 = tpu.matmul %142, %122, %cst_73 {dimension_numbers = #tpu.dot_dimension_numbers<[2], [2], [1], [1], [0, 0, 0, 1, 1, 1], [0], [0]>} : vector<4x8x32xf32>, vector<4x8x32xf32>, vector<4x8x8xf32> -> vector<4x8x8xf32>
    "tpu.trace_stop"() : () -> ()
    %144 = vector.shape_cast %124 : vector<4x8xf32> to vector<4x1x8xf32>
    %145 = vector.broadcast %144 : vector<4x1x8xf32> to vector<4x8x8xf32>
    %146 = arith.addf %143, %145 : vector<4x8x8xf32>
    %147 = vector.shape_cast %2 : vector<8x32xf32> to vector<1x8x32xf32>
    %148 = vector.shape_cast %147 : vector<1x8x32xf32> to vector<1x8x32xf32>
    %149 = vector.broadcast %148 : vector<1x8x32xf32> to vector<4x8x32xf32>
    "tpu.trace_start"() <{level = 10 : i32, message = "htd,hed->hte"}> : () -> ()
    %cst_74 = arith.constant dense<0.000000e+00> : vector<4x8x8xf32>
    %150 = tpu.matmul %149, %126, %cst_74 {dimension_numbers = #tpu.dot_dimension_numbers<[2], [2], [1], [1], [0, 0, 0, 1, 1, 1], [0], [0]>} : vector<4x8x32xf32>, vector<4x8x32xf32>, vector<4x8x8xf32> -> vector<4x8x8xf32>
    "tpu.trace_stop"() : () -> ()
    %151 = vector.shape_cast %128 : vector<4x8xf32> to vector<4x1x8xf32>
    %152 = vector.broadcast %151 : vector<4x1x8xf32> to vector<4x8x8xf32>
    %153 = arith.addf %150, %152 : vector<4x8x8xf32>
    "tpu.trace_start"() <{level = 10 : i32, message = "hqe,hke->hqk"}> : () -> ()
    %cst_75 = arith.constant dense<0.000000e+00> : vector<4x8x8xf32>
    %154 = tpu.matmul %139, %146, %cst_75 {dimension_numbers = #tpu.dot_dimension_numbers<[2], [2], [1], [1], [0, 0, 0, 1, 1, 1], [0], [0]>} : vector<4x8x8xf32>, vector<4x8x8xf32>, vector<4x8x8xf32> -> vector<4x8x8xf32>
    "tpu.trace_stop"() : () -> ()
    %cst_76 = arith.constant dense<0xFF800000> : vector<4x8xf32>
    %155 = vector.multi_reduction <maximumf>, %154, %cst_76 [2] : vector<4x8x8xf32> to vector<4x8xf32>
    %156 = vector.shape_cast %155 : vector<4x8xf32> to vector<4x8x1xf32>
    %157 = vector.broadcast %156 : vector<4x8x1xf32> to vector<4x8x8xf32>
    %158 = arith.subf %154, %157 : vector<4x8x8xf32>
    %159 = math.exp %158 : vector<4x8x8xf32>
    %cst_77 = arith.constant dense<0.000000e+00> : vector<4x8xf32>
    %160 = vector.multi_reduction <add>, %159, %cst_77 [2] : vector<4x8x8xf32> to vector<4x8xf32>
    %161 = vector.shape_cast %160 : vector<4x8xf32> to vector<4x8x1xf32>
    %162 = tpu.reciprocal %161 {approx = true} : vector<4x8x1xf32> -> vector<4x8x1xf32>
    %163 = vector.broadcast %162 : vector<4x8x1xf32> to vector<4x8x8xf32>
    %164 = arith.mulf %159, %163 : vector<4x8x8xf32>
    "tpu.trace_start"() <{level = 10 : i32, message = "hqk,hke->hqe"}> : () -> ()
    %cst_78 = arith.constant dense<0.000000e+00> : vector<4x8x8xf32>
    %165 = tpu.matmul %164, %153, %cst_78 {dimension_numbers = #tpu.dot_dimension_numbers<[2], [1], [1], [2], [0, 0, 0, 1, 1, 2], [0], [0]>} : vector<4x8x8xf32>, vector<4x8x8xf32>, vector<4x8x8xf32> -> vector<4x8x8xf32>
    "tpu.trace_stop"() : () -> ()
    "tpu.trace_start"() <{level = 10 : i32, message = "hqe,hed->hqd"}> : () -> ()
    %cst_79 = arith.constant dense<0.000000e+00> : vector<4x8x32xf32>
    %166 = tpu.matmul %165, %130, %cst_79 {dimension_numbers = #tpu.dot_dimension_numbers<[2], [1], [1], [2], [0, 0, 0, 1, 1, 2], [0], [0]>} : vector<4x8x8xf32>, vector<4x8x32xf32>, vector<4x8x32xf32> -> vector<4x8x32xf32>
    "tpu.trace_stop"() : () -> ()
    %cst_80 = arith.constant dense<0.000000e+00> : vector<8x32xf32>
    %167 = vector.multi_reduction <add>, %166, %cst_80 [0] : vector<4x8x32xf32> to vector<8x32xf32>
    %168 = vector.broadcast %5 : vector<1x32xf32> to vector<8x32xf32>
    %169 = arith.addf %167, %168 : vector<8x32xf32>
    %170 = vector.shape_cast %169 : vector<8x32xf32> to vector<8x1x32xf32>
    %171 = vector.shape_cast %170 : vector<8x1x32xf32> to vector<8x1x32xf32>
    %172 = vector.broadcast %171 : vector<8x1x32xf32> to vector<8x2x32xf32>
    %173 = vector.shape_cast %172 : vector<8x2x32xf32> to vector<16x32xf32>
    %174 = arith.addf %1, %173 : vector<16x32xf32>
    %cst_81 = arith.constant dense<0.000000e+00> : vector<16xf32>
    %175 = vector.multi_reduction <add>, %174, %cst_81 [1] : vector<16x32xf32> to vector<16xf32>
    %176 = vector.shape_cast %175 : vector<16xf32> to vector<16x1xf32>
    %cst_82 = arith.constant 3.200000e+01 : f32
    %177 = vector.broadcast %cst_82 : f32 to vector<16x1xf32>
    %178 = arith.divf %176, %177 : vector<16x1xf32>
    %179 = vector.broadcast %178 : vector<16x1xf32> to vector<16x32xf32>
    %180 = arith.subf %174, %179 : vector<16x32xf32>
    %181 = arith.mulf %180, %180 : vector<16x32xf32>
    %cst_83 = arith.constant dense<0.000000e+00> : vector<16xf32>
    %182 = vector.multi_reduction <add>, %181, %cst_83 [1] : vector<16x32xf32> to vector<16xf32>
    %183 = vector.shape_cast %182 : vector<16xf32> to vector<16x1xf32>
    %cst_84 = arith.constant 0.0322580636 : f32
    %184 = vector.broadcast %cst_84 : f32 to vector<16x1xf32>
    %185 = arith.mulf %183, %184 : vector<16x1xf32>
    %186 = math.sqrt %185 : vector<16x1xf32>
    %cst_85 = arith.constant 9.99999997E-7 : f32
    %187 = vector.broadcast %cst_85 : f32 to vector<16x1xf32>
    %188 = arith.addf %186, %187 : vector<16x1xf32>
    %189 = tpu.reciprocal %188 {approx = true} : vector<16x1xf32> -> vector<16x1xf32>
    %190 = vector.broadcast %178 : vector<16x1xf32> to vector<16x32xf32>
    %191 = arith.subf %174, %190 : vector<16x32xf32>
    %192 = vector.broadcast %189 : vector<16x1xf32> to vector<16x32xf32>
    %193 = arith.mulf %191, %192 : vector<16x32xf32>
    %194 = vector.broadcast %10 : vector<1x32xf32> to vector<16x32xf32>
    %195 = arith.mulf %194, %193 : vector<16x32xf32>
    %196 = vector.broadcast %11 : vector<1x32xf32> to vector<16x32xf32>
    %197 = arith.addf %195, %196 : vector<16x32xf32>
    %cst_86 = arith.constant dense<0.000000e+00> : vector<16x64xf32>
    %198 = tpu.matmul %197, %14, %cst_86 {dimension_numbers = #tpu.dot_dimension_numbers<[1], [0], [0], [1], [0, 0, 1, 1], [], []>} : vector<16x32xf32>, vector<32x64xf32>, vector<16x64xf32> -> vector<16x64xf32>
    %199 = vector.broadcast %16 : vector<1x64xf32> to vector<16x64xf32>
    %200 = arith.addf %198, %199 : vector<16x64xf32>
    %cst_87 = arith.constant 0.000000e+00 : f32
    %201 = vector.broadcast %cst_87 : f32 to vector<16x64xf32>
    %202 = arith.maximumf %200, %201 : vector<16x64xf32>
    %cst_88 = arith.constant dense<0.000000e+00> : vector<16x32xf32>
    %203 = tpu.matmul %202, %15, %cst_88 {dimension_numbers = #tpu.dot_dimension_numbers<[1], [0], [0], [1], [0, 0, 1, 1], [], []>} : vector<16x64xf32>, vector<64x32xf32>, vector<16x32xf32> -> vector<16x32xf32>
    %204 = arith.addf %197, %203 : vector<16x32xf32>
    %205 = vector.broadcast %12 : vector<1x32xf32> to vector<16x32xf32>
    %206 = arith.addf %204, %205 : vector<16x32xf32>
    %207 = vector.extract_strided_slice %206 {offsets = [0, 0], sizes = [2, 32], strides = [1, 1]} : vector<16x32xf32> to vector<2x32xf32>
    %208 = vector.extract_strided_slice %206 {offsets = [2, 0], sizes = [2, 32], strides = [1, 1]} : vector<16x32xf32> to vector<2x32xf32>
    %209 = vector.extract_strided_slice %206 {offsets = [4, 0], sizes = [2, 32], strides = [1, 1]} : vector<16x32xf32> to vector<2x32xf32>
    %210 = vector.extract_strided_slice %206 {offsets = [6, 0], sizes = [2, 32], strides = [1, 1]} : vector<16x32xf32> to vector<2x32xf32>
    %211 = vector.extract_strided_slice %206 {offsets = [8, 0], sizes = [2, 32], strides = [1, 1]} : vector<16x32xf32> to vector<2x32xf32>
    %212 = vector.extract_strided_slice %206 {offsets = [10, 0], sizes = [2, 32], strides = [1, 1]} : vector<16x32xf32> to vector<2x32xf32>
    %213 = vector.extract_strided_slice %206 {offsets = [12, 0], sizes = [2, 32], strides = [1, 1]} : vector<16x32xf32> to vector<2x32xf32>
    %214 = vector.extract_strided_slice %206 {offsets = [14, 0], sizes = [2, 32], strides = [1, 1]} : vector<16x32xf32> to vector<2x32xf32>
    %215 = tpu.concatenate %207, %208, %209, %210, %211, %212, %213, %214 in 1 : vector<2x32xf32>, vector<2x32xf32>, vector<2x32xf32>, vector<2x32xf32>, vector<2x32xf32>, vector<2x32xf32>, vector<2x32xf32>, vector<2x32xf32> -> vector<2x256xf32>
    %c0_89 = arith.constant 0 : index
    %c0_90 = arith.constant 0 : index
    %216 = vector.load %arg7[%c0_89, %c0_90] : memref<2x256xf32, #tpu.memory_space<vmem>>, vector<2x256xf32>
    tpu.vector_store %arg7[%c0_89, %c0_90], %215 {strides = array<i32>} : memref<2x256xf32, #tpu.memory_space<vmem>>, vector<2x256xf32>,
    return
  }
}

</mosaic_0001>

<bundles_post_ra>
// kernel: decoder_layer_forward.1
= control target key start
LH: loop header
LB: loop body
LE: loop exit
PB: predicated region body
PF: predicated region fallthrough
CT: control target
= control target key end

     0   :  { %vm45_vm0 = vcmask 261120   ;;  %v1867_v2 = vmov 32.0   ;;  %vm428_vm4 = vcmask 64512   ;;  %vm1614_vm11 = vcmask 523264   ;;  %s1869_s12 = smov 64   ;;  %s1870_s13 = smov 96   ;;  %s2237_s0 = inlined_call_operand.vmem [shape: f32[8,32], index: 0, kind: input, shape index: {}]   ;;  %s2238_s6 = inlined_call_operand.vmem [shape: f32[9,32], index: 6, kind: input, shape index: {}]   ;;  %s2239_s3 = inlined_call_operand.vmem [shape: f32[8,4,8,32], index: 3, kind: input, shape index: {}]   ;;  %s2240_s4 = inlined_call_operand.vmem [shape: f32[6,4,8], index: 4, kind: input, shape index: {}]   ;;  %s2241_s2 = inlined_call_operand.vmem [shape: f32[8,32], index: 2, kind: input, shape index: {}]   ;;  %s2242_s1 = inlined_call_operand.vmem [shape: f32[16,32], index: 1, kind: input, shape index: {}]   ;;  %s2243_s5 = inlined_call_operand.vmem [shape: f32[97,64], index: 5, kind: input, shape index: {}]   ;;  %s2244_s7 = inlined_call_operand.vmem [shape: f32[2,256], index: 7, kind: output, shape index: {}]  }
   0x1   :  { %v1914_v0 = vld [vmem:[%s2237_s0] sm:$0xff]  ;;  %1816 = vrcp.f32 %v1867_v2  ;;  %v83_v17 = vld [vmem:[%s2239_s3 + $0x8] sm:$0xff]  ;;  %v84_v20 = vld [vmem:[%s2239_s3 + $0x10] sm:$0xff]  ;;  %vm1677_vm12 = vcmask 785408   ;;  %vm1685_vm13 = vcmask 1041408  }
   0x2   :  { %v46_v1 = vsel %vm45_vm0, %v1914_v0, 0.0  ;;  %v82_v16 = vld [vmem:[%s2239_s3] sm:$0xff]  ;;  %1709 = vmatpush.xpose.msk.msra.mxu2 %vm45_vm0, %v83_v17  ;;  %v1694_v19 = vld [vmem:[%s2239_s3 + $0x28] sm:$0xff]  ;;  %v85_v21 = vld [vmem:[%s2239_s3 + $0x18] sm:$0xff] }
   0x3   :  { %47 = vadd.xlane.f32.xlu0 %v46_v1  ;;  %v1693_v18 = vld [vmem:[%s2239_s3 + $0x20] sm:$0xff]  ;;  %1707 = vmatpush.xpose.msk.msra.mxu3 %vm45_vm0, %v82_v16  ;;  %v1695_v40 = vld [vmem:[%s2239_s3 + $0x30] sm:$0xff]  ;;  %v1696_v41 = vld [vmem:[%s2239_s3 + $0x38] sm:$0xff] }
   0x4   :  { %1715 = vmatpush.xpose.msk.msra.mxu0 %vm45_vm0, %v1693_v18  ;;  %1717 = vmatpush.xpose.msk.msra.mxu1 %vm45_vm0, %v1694_v19  ;;  %v1950_v33 = vld [vmem:[%s2238_s6] sm:$0xff]  ;;  %v1699_v43 = vld [vmem:[%s2239_s3 + $0x48] sm:$0xff]  ;;  %v1700_v44 = vld [vmem:[%s2239_s3 + $0x50] sm:$0xff] }
   0x5   :  { %v78_v34 = vperm.slane %v1950_v33, 2  ;;  %v80_v37 = vperm.slane %v1950_v33, 3  ;;  %v1698_v42 = vld [vmem:[%s2239_s3 + $0x40] sm:$0xff]  ;;  %v1701_v45 = vld [vmem:[%s2239_s3 + $0x58] sm:$0xff] }
   0x6   :  { %1711 = vmatpush.xpose.msk.msrb.mxu2 %vm45_vm0, %v84_v20  ;;  %v1697_v46 = vld [vmem:[%s2240_s4 + $0x4] sm:$0xf]  ;;  %v86_v48 = vld [vmem:[%s2240_s4] sm:$0xf]  ;;  %v1702_v20 = vld [vmem:[%s2240_s4 + $0x8] sm:$0xf] }
   0x7   :  { %v1817_v3 = vpop.eup %1816  ;;  %1713 = vmatpush.xpose.msk.msrb.mxu3 %vm45_vm0, %v85_v21  ;;  %v218_v47 = vrot.slane %v1697_v46, 1  ;;  %v221_v49 = vperm.slane %v1697_v46, 0  ;;  %v107_v51 = vrot.slane %v86_v48, 1  ;;  %v110_v56 = vperm.slane %v86_v48, 0 }
   0x8   :  { %v50_v4 = vmul.f32 32.0, %v1817_v3  ;;  %vm54_vm1 = vweird.f32 %v1817_v3  ;;  %1723 = vmatpush.xpose.msk.msrb.mxu0 %vm45_vm0, %v1698_v42  ;;  %1725 = vmatpush.xpose.msk.msrb.mxu1 %vm45_vm0, %v1699_v43  ;;  %v108_v1 = vrot.slane %v86_v48, 2  ;;  %v322_v21 = vrot.slane %v1702_v20, 1 }
   0x9   :  { %v222_v50 = vperm.slane %v218_v47, 0  ;;  %v111_v57 = vperm.slane %v107_v51, 0 }
   0xa   :  { %v51_v5 = vsub.f32 1.0, %v50_v4 }
   0xc   :  { %v52_v6 = vmul.f32 %v1817_v3, %v51_v5  ;;  %v219_v5 = vrot.slane %v1697_v46, 2 }
   0xe   :  { %v53_v7 = vadd.f32 %v1817_v3, %v52_v6  ;;  %v220_v6 = vrot.slane %v1697_v46, 3 }
  0x10   :  { %v1918_v8 = vsel %vm54_vm1, %v1817_v3, %v53_v7  ;;  %v109_v3 = vrot.slane %v86_v48, 3  ;;  %v112_v7 = vperm.slane %v108_v1, 0 }
  0x76   :  { %v48_v9 = vpop.xlane.xlu0 %47 }
  0x77   :  { %v56_v10 = vmul.f32 %v1918_v8, %v48_v9  ;;  %v113_v9 = vperm.slane %v109_v3, 0 }
  0x79   :  { %v57_v11 = vsub.f32 %v1914_v0, %v56_v10  ;;  %v223_v10 = vperm.slane %v219_v5, 0 }
  0x7b   :  { %v58_v12 = vmul.f32 %v57_v11, %v57_v11 }
  0x7d   :  { %v59_v13 = vsel %vm45_vm0, %v58_v12, 0.0 }
  0x7e   :  { %60 = vadd.xlane.f32.xlu0 %v59_v13 }
  0xf1   :  { %v61_v14 = vpop.xlane.xlu0 %60 }
  0xf2   :  { %v62_v15 = vmul.f32 0.032258064, %v61_v14 }
  0xf4   :  { %1818 = vrsqrt.f32 %v62_v15  ;;  %vm70_vm2 = vcmp.eq.f32.partialorder %v62_v15, inf  ;;  %v73_v29 = vand.u32 2147483648, %v62_v15  ;;  %vm72_vm3 = vcmp.eq.f32.partialorder %v62_v15, 0.0 }
  0xfa   :  { %v1819_v22 = vpop.eup %1818 }
  0xfb   :  { %v64_v23 = vmul.f32 %v1819_v22, %v62_v15 }
  0xfd   :  { %v65_v24 = vmul.f32 %v1819_v22, %v64_v23  ;;  %v326_v23 = vperm.slane %v322_v21, 0 }
  0xff   :  { %v66_v25 = vmul.f32 0.5, %v65_v24 }
 0x101   :  { %v67_v26 = vsub.f32 1.5, %v66_v25 }
 0x103   :  { %v68_v27 = vmul.f32 %v1819_v22, %v67_v26  ;;  %v325_v22 = vperm.slane %v1702_v20, 0 }
 0x105   :  { %v69_v28 = vmul.f32 %v68_v27, %v62_v15 }
 0x107   :  { %v71_v30 = vsel %vm70_vm2, %v62_v15, %v69_v28  ;;  %v323_v28 = vrot.slane %v1702_v20, 2 }
 0x108   :  { %v74_v31 = vsel %vm72_vm3, %v73_v29, %v71_v30  ;;  %v324_v29 = vrot.slane %v1702_v20, 3 }
 0x109   :  { %v75_v32 = vadd.f32 1e-06, %v74_v31  ;;  %v327_v30 = vperm.slane %v323_v28, 0 }
 0x10a   :  { %v328_v31 = vperm.slane %v324_v29, 0 }
 0x10b   :  { %1820 = vrcp.f32 %v75_v32 }
 0x111   :  { %v1821_v35 = vpop.eup %1820 }
 0x112   :  { %v77_v36 = vmul.f32 %v1821_v35, %v57_v11  ;;  %v224_v11 = vperm.slane %v220_v6, 0 }
 0x114   :  { %v79_v38 = vmul.f32 %v78_v34, %v77_v36 }
 0x116   :  { %v81_v39 = vadd.f32 %v80_v37, %v79_v38 }
 0x118   :  { %1708 = vmatmul.msk.f32.vlgmr.msra.gmra.mxu3 %vm45_vm0, %v81_v39  ;;  %1710 = vmatmul.msk.f32.vlgmr.msra.gmra.mxu2 %vm45_vm0, %v81_v39 }
 0x119   :  { %1716 = vmatmul.msk.f32.vlgmr.msra.gmra.mxu0 %vm45_vm0, %v81_v39  ;;  %1718 = vmatmul.msk.f32.vlgmr.msra.gmra.mxu1 %vm45_vm0, %v81_v39 }
 0x11a   :  { %1719 = vmatpush.xpose.msk.msra.mxu2 %vm45_vm0, %v1695_v40  ;;  %1721 = vmatpush.xpose.msk.msra.mxu3 %vm45_vm0, %v1696_v41 }
 0x120   :  { %1712 = vmatmul.msk.f32.vlgmr.msrb.gmra.mxu2 %vm45_vm0, %v81_v39  ;;  %1714 = vmatmul.msk.f32.vlgmr.msrb.gmra.mxu3 %vm45_vm0, %v81_v39 }
 0x121   :  { %1724 = vmatmul.msk.f32.vlgmr.msrb.gmra.mxu0 %vm45_vm0, %v1914_v0  ;;  %1726 = vmatmul.msk.f32.vlgmr.msrb.gmra.mxu1 %vm45_vm0, %v1914_v0 }
 0x122   :  { %1727 = vmatpush.xpose.msk.msrb.mxu2 %vm45_vm0, %v1700_v44  ;;  %1729 = vmatpush.xpose.msk.msrb.mxu3 %vm45_vm0, %v1701_v45 }
 0x128   :  { %1720 = vmatmul.msk.f32.vlgmr.msra.gmra.mxu2 %vm45_vm0, %v81_v39  ;;  %1722 = vmatmul.msk.f32.vlgmr.msra.gmra.mxu3 %vm45_vm0, %v81_v39 }
 0x130   :  { %1728 = vmatmul.msk.f32.vlgmr.msrb.gmra.mxu2 %vm45_vm0, %v1914_v0  ;;  %1730 = vmatmul.msk.f32.vlgmr.msrb.gmra.mxu3 %vm45_vm0, %v1914_v0 }
 0x196   :  { %v249_v52 = vpop.f32.mrf.mxu0  ;;  %v272_v53 = vpop.f32.mrf.mxu1 }
 0x197   :  { %v250_v54 = vadd.f32 %v249_v52, %v221_v49  ;;  %v273_v55 = vadd.f32 %v272_v53, %v222_v50 }
 0x199   :  { %1731 = vmatpush.xpose.msk.msra.mxu0 %vm428_vm4, %v250_v54  ;;  %1733 = vmatpush.xpose.msk.msra.mxu1 %vm428_vm4, %v273_v55 }
 0x19b   :  { %v141_v58 = vpop.f32.mrf.mxu3  ;;  %v164_v59 = vpop.f32.mrf.mxu2 }
 0x19c   :  { %v142_v60 = vadd.f32 %v141_v58, %v110_v56  ;;  %v165_v61 = vadd.f32 %v164_v59, %v111_v57 }
 0x19e   :  { %v213_v62 = vmul.f32 0.35355338, %v142_v60  ;;  %v214_v63 = vmul.f32 0.35355338, %v165_v61  ;;  %v356_v24 = vpop.f32.mrf.mxu0  ;;  %v379_v25 = vpop.f32.mrf.mxu1 }
 0x19f   :  { %v357_v26 = vadd.f32 %v356_v24, %v325_v22  ;;  %v380_v27 = vadd.f32 %v379_v25, %v326_v23 }
 0x1a0   :  { %1732 = vmatmul.msk.f32.vlgmr.msra.gmra.mxu0 %vm428_vm4, %v213_v62  ;;  %1734 = vmatmul.msk.f32.vlgmr.msra.gmra.mxu1 %vm428_vm4, %v214_v63 }
 0x1a1   :  { %595 = vmatpush.msrb.mxu0 %v357_v26  ;;  %618 = vmatpush.msrb.mxu1 %v380_v27 }
 0x1a3   :  { %v187_v2 = vpop.f32.mrf.mxu2  ;;  %v210_v4 = vpop.f32.mrf.mxu3 }
 0x1a4   :  { %v188_v12 = vadd.f32 %v187_v2, %v112_v7  ;;  %v211_v13 = vadd.f32 %v210_v4, %v113_v9 }
 0x1a6   :  { %v215_v18 = vmul.f32 0.35355338, %v188_v12  ;;  %v216_v19 = vmul.f32 0.35355338, %v211_v13 }
 0x1ab   :  { %v295_v14 = vpop.f32.mrf.mxu2  ;;  %v318_v15 = vpop.f32.mrf.mxu3 }
 0x1ac   :  { %v296_v16 = vadd.f32 %v295_v14, %v223_v10  ;;  %v319_v17 = vadd.f32 %v318_v15, %v224_v11  ;;  %v1703_v15 = vld [vmem:[%s2239_s3 + $0x60] sm:$0xff] }
 0x1ad   :  { %687 = vmatpush.msra.mxu0 %v1703_v15 }
 0x1ae   :  { %1735 = vmatpush.xpose.msk.msra.mxu2 %vm428_vm4, %v296_v16  ;;  %1737 = vmatpush.xpose.msk.msra.mxu3 %vm428_vm4, %v319_v17  ;;  %v1705_v16 = vld [vmem:[%s2239_s3 + $0x70] sm:$0xff]  ;;  %v1704_v17 = vld [vmem:[%s2239_s3 + $0x68] sm:$0xff] }
 0x1af   :  { %710 = vmatpush.msra.mxu1 %v1704_v17 }
 0x1b1   :  { %1736 = vmatmul.msk.f32.vlgmr.msra.gmra.mxu2 %vm428_vm4, %v215_v18  ;;  %1738 = vmatmul.msk.f32.vlgmr.msra.gmra.mxu3 %vm428_vm4, %v216_v19  ;;  %v1706_v19 = vld [vmem:[%s2239_s3 + $0x78] sm:$0xff] }
 0x1b3   :  { %v402_v32 = vpop.f32.mrf.mxu2  ;;  %v425_v34 = vpop.f32.mrf.mxu3 }
 0x1b4   :  { %v403_v35 = vadd.f32 %v402_v32, %v327_v30  ;;  %v426_v36 = vadd.f32 %v425_v34, %v328_v31  ;;  %v768_v32 = vperm.slane %v1950_v33, 0 }
 0x1b6   :  { %641 = vmatpush.msrb.mxu2 %v403_v35  ;;  %664 = vmatpush.msrb.mxu3 %v426_v36 }
 0x1b8   :  { %733 = vmatpush.msra.mxu2 %v1705_v16  ;;  %756 = vmatpush.msra.mxu3 %v1706_v19 }
 0x21d   :  { %v452_v37 = vpop.f32.mrf.mxu0  ;;  %v478_v39 = vpop.f32.mrf.mxu1 }
 0x21e   :  { %v533_v38 = vsel %vm428_vm4, %v452_v37, -inf  ;;  %v536_v40 = vsel %vm428_vm4, %v478_v39, -inf }
 0x21f   :  { %534 = vmax.xlane.f32.xlu2 %v533_v38 }
 0x227   :  { %537 = vmax.xlane.f32.xlu2 %v536_v40 }
 0x234   :  { %v504_v41 = vpop.f32.mrf.mxu2  ;;  %v530_v43 = vpop.f32.mrf.mxu3 }
 0x235   :  { %v539_v42 = vsel %vm428_vm4, %v504_v41, -inf  ;;  %v542_v44 = vsel %vm428_vm4, %v530_v43, -inf }
 0x236   :  { %540 = vmax.xlane.f32.xlu1 %v539_v42 }
 0x23e   :  { %543 = vmax.xlane.f32.xlu1 %v542_v44  ;;  %v1747_v44 = vld [vmem:[%s2239_s3 + $0x80] sm:$0xff] }
 0x292   :  { %v535_v45 = vpop.xlane.xlu2 %534 }
 0x293   :  { %v545_v46 = vsub.f32 %v452_v37, %v535_v45  ;;  %v1748_v45 = vld [vmem:[%s2239_s3 + $0x88] sm:$0xff] }
 0x295   :  { %v549_v47 = vmul.f32 1.442695, %v545_v46  ;;  %v1750_v46 = vld [vmem:[%s2239_s3 + $0x98] sm:$0xff] }
 0x297   :  { %1822 = vpow2.f32 %v549_v47 }
 0x29a   :  { %v538_v50 = vpop.xlane.xlu2 %537 }
 0x29b   :  { %v546_v53 = vsub.f32 %v478_v39, %v538_v50  ;;  %v1753_v50 = vld [vmem:[%s2239_s3 + $0xa8] sm:$0xff] }
 0x29d   :  { %v1823_v48 = vpop.eup %1822  ;;  %v551_v55 = vmul.f32 1.442695, %v546_v53  ;;  %v1755_v53 = vld [vmem:[%s2239_s3 + $0xb8] sm:$0xff] }
 0x29e   :  { %v557_v49 = vsel %vm428_vm4, %v1823_v48, 0.0 }
 0x29f   :  { %558 = vadd.xlane.f32.xlu2 %v557_v49  ;;  %v1752_v49 = vld [vmem:[%s2239_s3 + $0xa0] sm:$0xff] }
 0x2a9   :  { %v541_v51 = vpop.xlane.xlu1 %540 }
 0x2aa   :  { %v547_v52 = vsub.f32 %v504_v41, %v541_v51  ;;  %v1754_v51 = vld [vmem:[%s2239_s3 + $0xb0] sm:$0xff] }
 0x2ac   :  { %v553_v54 = vmul.f32 1.442695, %v547_v52 }
 0x2ae   :  { %1824 = vpow2.f32 %v553_v54 }
 0x2af   :  { %1826 = vpow2.f32 %v551_v55 }
 0x2b1   :  { %v544_v56 = vpop.xlane.xlu1 %543 }
 0x2b2   :  { %v548_v57 = vsub.f32 %v530_v43, %v544_v56 }
 0x2b4   :  { %v1825_v58 = vpop.eup %1824  ;;  %v555_v59 = vmul.f32 1.442695, %v548_v57 }
 0x2b5   :  { %v563_v60 = vsel %vm428_vm4, %v1825_v58, 0.0  ;;  %v1827_v61 = vpop.eup %1826 }
 0x2b6   :  { %1828 = vpow2.f32 %v555_v59  ;;  %564 = vadd.xlane.f32.xlu0 %v563_v60  ;;  %v560_v1 = vsel %vm428_vm4, %v1827_v61, 0.0 }
 0x2bc   :  { %v1829_v62 = vpop.eup %1828 }
 0x2bd   :  { %v566_v63 = vsel %vm428_vm4, %v1829_v62, 0.0 }
 0x2be   :  { %567 = vadd.xlane.f32.xlu1 %v566_v63  ;;  %561 = vadd.xlane.f32.xlu0 %v560_v1  ;;  %v796_v1 = vperm.slane %v1950_v33, 4 }
 0x312   :  { %v559_v2 = vpop.xlane.xlu2 %558 }
 0x313   :  { %1830 = vrcp.f32 %v559_v2 }
 0x319   :  { %v1831_v3 = vpop.eup %1830 }
 0x31a   :  { %v573_v4 = vmul.f32 %v1831_v3, %v1823_v48 }
 0x31c   :  { %1739 = vmatmul.msk.f32.vlgmr.msrb.gmra.mxu0 %vm428_vm4, %v573_v4  ;;  %v798_v4 = vperm.slane %v1950_v33, 5 }
 0x31d   :  { %1766 = vmatpush.xpose.msk.msrb.mxu0 %vm45_vm0, %v1747_v44 }
 0x329   :  { %v565_v5 = vpop.xlane.xlu0 %564 }
 0x32a   :  { %1832 = vrcp.f32 %v565_v5 }
 0x330   :  { %v1833_v6 = vpop.eup %1832 }
 0x331   :  { %v575_v7 = vmul.f32 %v1833_v6, %v1825_v58  ;;  %v568_v9 = vpop.xlane.xlu1 %567  ;;  %v562_v10 = vpop.xlane.xlu0 %561 }
 0x332   :  { %1834 = vrcp.f32 %v568_v9  ;;  %v1757_v9 = vld [vmem:[%s2239_s3 + $0xc0] sm:$0xff] }
 0x333   :  { %1836 = vrcp.f32 %v562_v10  ;;  %1741 = vmatmul.msk.f32.vlgmr.msrb.gmra.mxu2 %vm428_vm4, %v575_v7  ;;  %v29_v7 = vld [vmem:[%s2241_s2] sm:$0xff]  ;;  %v1758_v10 = vld [vmem:[%s2239_s3 + $0xc8] sm:$0xff] }
 0x338   :  { %v1835_v11 = vpop.eup %1834 }
 0x339   :  { %v1837_v12 = vpop.eup %1836  ;;  %v576_v13 = vmul.f32 %v1835_v11, %v1829_v62  ;;  %v1759_v11 = vld [vmem:[%s2239_s3 + $0xd0] sm:$0xff] }
 0x33a   :  { %v574_v14 = vmul.f32 %v1837_v12, %v1827_v61  ;;  %v1760_v12 = vld [vmem:[%s2239_s3 + $0xd8] sm:$0xff] }
 0x33b   :  { %1742 = vmatmul.msk.f32.vlgmr.msrb.gmra.mxu3 %vm428_vm4, %v576_v13  ;;  %v1751_v13 = vld [vmem:[%s2240_s4 + $0xc] sm:$0xf] }
 0x33c   :  { %1740 = vmatmul.msk.f32.vlgmr.msrb.gmra.mxu1 %vm428_vm4, %v574_v14  ;;  %1772 = vmatpush.xpose.msk.msrb.mxu3 %vm45_vm0, %v1750_v46  ;;  %v1756_v14 = vld [vmem:[%s2240_s4 + $0x10] sm:$0xf]  ;;  %v827_v16 = vrot.slane %v1751_v13, 1  ;;  %v830_v19 = vperm.slane %v1751_v13, 0 }
 0x33d   :  { %1768 = vmatpush.xpose.msk.msrb.mxu1 %vm45_vm0, %v1748_v45 }
 0x399   :  { %v597_v18 = vpop.f32.mrf.mxu0 }
 0x39a   :  { %1743 = vmatmul.msk.f32.vlgmr.msra.gmra.mxu0 %vm428_vm4, %v597_v18  ;;  %v938_v18 = vrot.slane %v1756_v14, 1 }
 0x39b   :  { %1774 = vmatpush.xpose.msk.msra.mxu0 %vm45_vm0, %v1752_v49  ;;  %v1761_v49 = vld [vmem:[%s2240_s4 + $0x14] sm:$0xf] }
 0x3b6   :  { %v643_v20 = vpop.f32.mrf.mxu2 }
 0x3b7   :  { %1745 = vmatmul.msk.f32.vlgmr.msra.gmra.mxu2 %vm428_vm4, %v643_v20  ;;  %v831_v20 = vperm.slane %v827_v16, 0 }
 0x3b9   :  { %v620_v21 = vpop.f32.mrf.mxu1 }
 0x3ba   :  { %1744 = vmatmul.msk.f32.vlgmr.msra.gmra.mxu1 %vm428_vm4, %v620_v21  ;;  %v941_v21 = vperm.slane %v1756_v14, 0 }
 0x3bb   :  { %1776 = vmatpush.xpose.msk.msra.mxu1 %vm45_vm0, %v1753_v50  ;;  %v1045_v50 = vrot.slane %v1761_v49, 1 }
 0x3be   :  { %v666_v22 = vpop.f32.mrf.mxu3 }
 0x3bf   :  { %1746 = vmatmul.msk.f32.vlgmr.msra.gmra.mxu3 %vm428_vm4, %v666_v22  ;;  %v942_v22 = vperm.slane %v938_v18, 0 }
 0x3c0   :  { %1780 = vmatpush.xpose.msk.msra.mxu3 %vm45_vm0, %v1755_v53 }
 0x417   :  { %v689_v24 = vpop.f32.mrf.mxu0 }
 0x418   :  { %v761_v27 = vsel %vm45_vm0, %v689_v24, 0.0 }
 0x437   :  { %v712_v23 = vpop.f32.mrf.mxu1 }
 0x438   :  { %v762_v26 = vsel %vm45_vm0, %v712_v23, 0.0  ;;  %v828_v23 = vrot.slane %v1751_v13, 2 }
 0x439   :  { %v763_v29 = vadd.f32 %v762_v26, %v761_v27 }
 0x43a   :  { %v735_v25 = vpop.f32.mrf.mxu2 }
 0x43b   :  { %v764_v28 = vsel %vm45_vm0, %v735_v25, 0.0  ;;  %v829_v25 = vrot.slane %v1751_v13, 3 }
 0x43c   :  { %v765_v30 = vadd.f32 %v764_v28, %v763_v29 }
 0x442   :  { %v758_v31 = vpop.f32.mrf.mxu3 }
 0x443   :  { %v766_v34 = vsel %vm45_vm0, %v758_v31, 0.0  ;;  %v939_v31 = vrot.slane %v1756_v14, 2 }
 0x444   :  { %v767_v35 = vadd.f32 %v766_v34, %v765_v30 }
 0x446   :  { %v769_v36 = vadd.f32 %v768_v32, %v767_v35  ;;  %v940_v32 = vrot.slane %v1756_v14, 3 }
 0x448   :  { %v770_v37 = vadd.f32 %v769_v36, %v1914_v0  ;;  %v1749_v0 = vld [vmem:[%s2239_s3 + $0x90] sm:$0xff]  ;;  %v832_v36 = vperm.slane %v828_v23, 0 }
 0x449   :  { %1770 = vmatpush.xpose.msk.msrb.mxu2 %vm45_vm0, %v1749_v0 }
 0x44a   :  { %v771_v38 = vsel %vm45_vm0, %v770_v37, 0.0 }
 0x44b   :  { %772 = vadd.xlane.f32.xlu1 %v771_v38 }
 0x44d   :  { %1778 = vmatpush.xpose.msk.msra.mxu2 %vm45_vm0, %v1754_v51  ;;  %v1048_v51 = vperm.slane %v1761_v49, 0 }
 0x4be   :  { %v773_v39 = vpop.xlane.xlu1 %772 }
 0x4bf   :  { %v774_v40 = vmul.f32 %v773_v39, %v1918_v8 }
 0x4c1   :  { %v775_v41 = vsub.f32 %v770_v37, %v774_v40  ;;  %v833_v37 = vperm.slane %v829_v25, 0  ;;  %v943_v40 = vperm.slane %v939_v31, 0 }
 0x4c3   :  { %v776_v42 = vmul.f32 %v775_v41, %v775_v41 }
 0x4c5   :  { %v777_v43 = vsel %vm45_vm0, %v776_v42, 0.0 }
 0x4c6   :  { %778 = vadd.xlane.f32.xlu2 %v777_v43 }
 0x539   :  { %v779_v47 = vpop.xlane.xlu2 %778 }
 0x53a   :  { %v780_v48 = vmul.f32 0.032258064, %v779_v47 }
 0x53c   :  { %1838 = vrsqrt.f32 %v780_v48  ;;  %vm788_vm5 = vcmp.eq.f32.partialorder %v780_v48, inf  ;;  %v791_v60 = vand.u32 2147483648, %v780_v48  ;;  %vm790_vm6 = vcmp.eq.f32.partialorder %v780_v48, 0.0 }
 0x542   :  { %v1839_v52 = vpop.eup %1838 }
 0x543   :  { %v782_v54 = vmul.f32 %v1839_v52, %v780_v48 }
 0x545   :  { %v783_v55 = vmul.f32 %v1839_v52, %v782_v54 }
 0x547   :  { %v784_v56 = vmul.f32 0.5, %v783_v55 }
 0x549   :  { %v785_v57 = vsub.f32 1.5, %v784_v56 }
 0x54b   :  { %v786_v58 = vmul.f32 %v1839_v52, %v785_v57  ;;  %v1049_v52 = vperm.slane %v1045_v50, 0  ;;  %v1046_v57 = vrot.slane %v1761_v49, 2 }
 0x54d   :  { %v787_v59 = vmul.f32 %v786_v58, %v780_v48  ;;  %v1047_v58 = vrot.slane %v1761_v49, 3 }
 0x54f   :  { %v789_v61 = vsel %vm788_vm5, %v780_v48, %v787_v59  ;;  %v1050_v59 = vperm.slane %v1046_v57, 0 }
 0x550   :  { %v792_v62 = vsel %vm790_vm6, %v791_v60, %v789_v61  ;;  %v1051_v60 = vperm.slane %v1047_v58, 0 }
 0x551   :  { %v793_v63 = vadd.f32 1e-06, %v792_v62 }
 0x553   :  { %1840 = vrcp.f32 %v793_v63 }
 0x559   :  { %v1841_v2 = vpop.eup %1840 }
 0x55a   :  { %v795_v3 = vmul.f32 %v1841_v2, %v775_v41  ;;  %v944_v41 = vperm.slane %v940_v32, 0 }
 0x55c   :  { %v797_v5 = vmul.f32 %v796_v1, %v795_v3 }
 0x55e   :  { %v799_v6 = vadd.f32 %v798_v4, %v797_v5 }
 0x560   :  { %1767 = vmatmul.msk.f32.vlgmr.msrb.gmra.mxu0 %vm45_vm0, %v799_v6  ;;  %1769 = vmatmul.msk.f32.vlgmr.msrb.gmra.mxu1 %vm45_vm0, %v799_v6 }
 0x561   :  { %1771 = vmatmul.msk.f32.vlgmr.msrb.gmra.mxu2 %vm45_vm0, %v799_v6  ;;  %1773 = vmatmul.msk.f32.vlgmr.msrb.gmra.mxu3 %vm45_vm0, %v799_v6 }
 0x562   :  { %1782 = vmatpush.xpose.msk.msrb.mxu0 %vm45_vm0, %v1757_v9  ;;  %1784 = vmatpush.xpose.msk.msrb.mxu1 %vm45_vm0, %v1758_v10 }
 0x563   :  { %1786 = vmatpush.xpose.msk.msrb.mxu2 %vm45_vm0, %v1759_v11  ;;  %1788 = vmatpush.xpose.msk.msrb.mxu3 %vm45_vm0, %v1760_v12 }
 0x568   :  { %1775 = vmatmul.msk.f32.vlgmr.msra.gmra.mxu0 %vm45_vm0, %v29_v7  ;;  %1777 = vmatmul.msk.f32.vlgmr.msra.gmra.mxu1 %vm45_vm0, %v29_v7 }
 0x569   :  { %1779 = vmatmul.msk.f32.vlgmr.msra.gmra.mxu2 %vm45_vm0, %v29_v7  ;;  %1781 = vmatmul.msk.f32.vlgmr.msra.gmra.mxu3 %vm45_vm0, %v29_v7 }
 0x570   :  { %1783 = vmatmul.msk.f32.vlgmr.msrb.gmra.mxu0 %vm45_vm0, %v29_v7  ;;  %1785 = vmatmul.msk.f32.vlgmr.msrb.gmra.mxu1 %vm45_vm0, %v29_v7 }
 0x571   :  { %1787 = vmatmul.msk.f32.vlgmr.msrb.gmra.mxu2 %vm45_vm0, %v29_v7  ;;  %1789 = vmatmul.msk.f32.vlgmr.msrb.gmra.mxu3 %vm45_vm0, %v29_v7 }
 0x5dd   :  { %v861_v15 = vpop.f32.mrf.mxu0  ;;  %v884_v17 = vpop.f32.mrf.mxu1 }
 0x5de   :  { %v862_v27 = vadd.f32 %v861_v15, %v830_v19  ;;  %v885_v28 = vadd.f32 %v884_v17, %v831_v20 }
 0x5e0   :  { %v933_v38 = vmul.f32 0.35355338, %v862_v27  ;;  %v934_v39 = vmul.f32 0.35355338, %v885_v28 }
 0x5e4   :  { %v907_v24 = vpop.f32.mrf.mxu2  ;;  %v930_v26 = vpop.f32.mrf.mxu3 }
 0x5e5   :  { %v972_v29 = vpop.f32.mrf.mxu0  ;;  %v995_v30 = vpop.f32.mrf.mxu1  ;;  %v908_v42 = vadd.f32 %v907_v24, %v832_v36  ;;  %v931_v43 = vadd.f32 %v930_v26, %v833_v37 }
 0x5e6   :  { %v973_v34 = vadd.f32 %v972_v29, %v941_v21  ;;  %v996_v35 = vadd.f32 %v995_v30, %v942_v22 }
 0x5e7   :  { %v935_v47 = vmul.f32 0.35355338, %v908_v42  ;;  %v936_v48 = vmul.f32 0.35355338, %v931_v43 }
 0x5e8   :  { %1790 = vmatpush.xpose.msk.msra.mxu0 %vm428_vm4, %v973_v34  ;;  %1792 = vmatpush.xpose.msk.msra.mxu1 %vm428_vm4, %v996_v35 }
 0x5eb   :  { %1791 = vmatmul.msk.f32.vlgmr.msra.gmra.mxu0 %vm428_vm4, %v933_v38  ;;  %1793 = vmatmul.msk.f32.vlgmr.msra.gmra.mxu1 %vm428_vm4, %v934_v39 }
 0x5ec   :  { %v1018_v44 = vpop.f32.mrf.mxu2  ;;  %v1041_v45 = vpop.f32.mrf.mxu3 }
 0x5ed   :  { %v1019_v0 = vadd.f32 %v1018_v44, %v943_v40  ;;  %v1042_v46 = vadd.f32 %v1041_v45, %v944_v41  ;;  %v1076_v53 = vpop.f32.mrf.mxu0  ;;  %v1099_v54 = vpop.f32.mrf.mxu1  ;;  %v1762_v44 = vld [vmem:[%s2239_s3 + $0xe0] sm:$0xff]  ;;  %v1764_v45 = vld [vmem:[%s2239_s3 + $0xf0] sm:$0xff] }
 0x5ee   :  { %v1077_v55 = vadd.f32 %v1076_v53, %v1048_v51  ;;  %v1100_v56 = vadd.f32 %v1099_v54, %v1049_v52 }
 0x5ef   :  { %1794 = vmatpush.xpose.msk.msra.mxu2 %vm428_vm4, %v1019_v0  ;;  %1796 = vmatpush.xpose.msk.msra.mxu3 %vm428_vm4, %v1042_v46  ;;  %v1765_v0 = vld [vmem:[%s2239_s3 + $0xf8] sm:$0xff]  ;;  %v1763_v46 = vld [vmem:[%s2239_s3 + $0xe8] sm:$0xff] }
 0x5f0   :  { %1337 = vmatpush.msrb.mxu1 %v1100_v56  ;;  %1314 = vmatpush.msrb.mxu0 %v1077_v55 }
 0x5f2   :  { %1795 = vmatmul.msk.f32.vlgmr.msra.gmra.mxu2 %vm428_vm4, %v935_v47  ;;  %1797 = vmatmul.msk.f32.vlgmr.msra.gmra.mxu3 %vm428_vm4, %v936_v48 }
 0x5f3   :  { %1406 = vmatpush.msra.mxu0 %v1762_v44  ;;  %1429 = vmatpush.msra.mxu1 %v1763_v46 }
 0x5f4   :  { %v1122_v61 = vpop.f32.mrf.mxu2  ;;  %v1145_v62 = vpop.f32.mrf.mxu3 }
 0x5f5   :  { %v1123_v63 = vadd.f32 %v1122_v61, %v1050_v59  ;;  %v1146_v1 = vadd.f32 %v1145_v62, %v1051_v60  ;;  %v1487_v60 = vperm.slane %v1950_v33, 1 }
 0x5f7   :  { %1360 = vmatpush.msrb.mxu2 %v1123_v63  ;;  %1383 = vmatpush.msrb.mxu3 %v1146_v1 }
 0x5f9   :  { %1452 = vmatpush.msra.mxu2 %v1764_v45  ;;  %1475 = vmatpush.msra.mxu3 %v1765_v0 }
 0x668   :  { %v1171_v2 = vpop.f32.mrf.mxu0  ;;  %v1197_v9 = vpop.f32.mrf.mxu1 }
 0x669   :  { %v1252_v3 = vsel %vm428_vm4, %v1171_v2, -inf  ;;  %v1255_v10 = vsel %vm428_vm4, %v1197_v9, -inf }
 0x66a   :  { %1253 = vmax.xlane.f32.xlu2 %v1252_v3 }
 0x675   :  { %v1223_v4 = vpop.f32.mrf.mxu2  ;;  %v1249_v5 = vpop.f32.mrf.mxu3 }
 0x676   :  { %v1261_v6 = vsel %vm428_vm4, %v1249_v5, -inf  ;;  %v1258_v7 = vsel %vm428_vm4, %v1223_v4, -inf }
 0x677   :  { %1262 = vmax.xlane.f32.xlu1 %v1261_v6  ;;  %1259 = vmax.xlane.f32.xlu0 %v1258_v7 }
 0x67f   :  { %1256 = vmax.xlane.f32.xlu0 %v1255_v10 }
 0x6dd   :  { %v1254_v11 = vpop.xlane.xlu2 %1253 }
 0x6de   :  { %v1264_v12 = vsub.f32 %v1171_v2, %v1254_v11 }
 0x6e0   :  { %v1268_v13 = vmul.f32 1.442695, %v1264_v12 }
 0x6e2   :  { %1842 = vpow2.f32 %v1268_v13 }
 0x6e8   :  { %v1843_v14 = vpop.eup %1842 }
 0x6e9   :  { %v1276_v15 = vsel %vm428_vm4, %v1843_v14, 0.0 }
 0x6ea   :  { %v1263_v16 = vpop.xlane.xlu1 %1262  ;;  %v1260_v17 = vpop.xlane.xlu0 %1259  ;;  %1277 = vadd.xlane.f32.xlu0 %v1276_v15 }
 0x6eb   :  { %v1267_v18 = vsub.f32 %v1249_v5, %v1263_v16  ;;  %v1266_v19 = vsub.f32 %v1223_v4, %v1260_v17  ;;  %v28_v17 = vld [vmem:[%s2242_s1 + $0x8] sm:$0xff] }
 0x6ed   :  { %v1274_v20 = vmul.f32 1.442695, %v1267_v18  ;;  %v1272_v21 = vmul.f32 1.442695, %v1266_v19 }
 0x6ef   :  { %1844 = vpow2.f32 %v1274_v20  ;;  %v27_v20 = vld [vmem:[%s2242_s1] sm:$0xff] }
 0x6f0   :  { %1846 = vpow2.f32 %v1272_v21 }
 0x6f2   :  { %v1257_v22 = vpop.xlane.xlu0 %1256 }
 0x6f3   :  { %v1265_v23 = vsub.f32 %v1197_v9, %v1257_v22 }
 0x6f5   :  { %v1845_v24 = vpop.eup %1844  ;;  %v1270_v25 = vmul.f32 1.442695, %v1265_v23 }
 0x6f6   :  { %v1847_v26 = vpop.eup %1846  ;;  %v1285_v27 = vsel %vm428_vm4, %v1845_v24, 0.0 }
 0x6f7   :  { %1848 = vpow2.f32 %v1270_v25  ;;  %v1282_v28 = vsel %vm428_vm4, %v1847_v26, 0.0  ;;  %1286 = vadd.xlane.f32.xlu2 %v1285_v27 }
 0x6f8   :  { %1283 = vadd.xlane.f32.xlu1 %v1282_v28 }
 0x6fd   :  { %v1849_v29 = vpop.eup %1848 }
 0x6fe   :  { %v1279_v30 = vsel %vm428_vm4, %v1849_v29, 0.0 }
 0x700   :  { %1280 = vadd.xlane.f32.xlu1 %v1279_v30 }
 0x75d   :  { %v1278_v31 = vpop.xlane.xlu0 %1277 }
 0x75e   :  { %1850 = vrcp.f32 %v1278_v31 }
 0x764   :  { %v1851_v32 = vpop.eup %1850 }
 0x765   :  { %v1292_v34 = vmul.f32 %v1851_v32, %v1843_v14 }
 0x767   :  { %1798 = vmatmul.msk.f32.vlgmr.msrb.gmra.mxu0 %vm428_vm4, %v1292_v34 }
 0x76a   :  { %v1287_v35 = vpop.xlane.xlu2 %1286 }
 0x76b   :  { %v1284_v36 = vpop.xlane.xlu1 %1283  ;;  %1852 = vrcp.f32 %v1287_v35 }
 0x76c   :  { %1854 = vrcp.f32 %v1284_v36  ;;  %v35_v36 = vld [vmem:[%s2243_s5 + $0x18] sm:$0xff] }
 0x76d   :  { %1601 = vmatpush.msrb.mxu0 %v35_v36 }
 0x771   :  { %v1853_v37 = vpop.eup %1852 }
 0x772   :  { %v1855_v38 = vpop.eup %1854  ;;  %v1295_v39 = vmul.f32 %v1853_v37, %v1845_v24  ;;  %v34_v37 = vld [vmem:[%s2243_s5 + $0x10] sm:$0xff] }
 0x773   :  { %v1294_v40 = vmul.f32 %v1855_v38, %v1847_v26  ;;  %v1281_v41 = vpop.xlane.xlu1 %1280  ;;  %1602 = vmatpush.msrb.mxu0 %v34_v37  ;;  %v32_v38 = vld [vmem:[%s2243_s5] sm:$0xff] }
 0x774   :  { %1856 = vrcp.f32 %v1281_v41  ;;  %1801 = vmatmul.msk.f32.vlgmr.msrb.gmra.mxu3 %vm428_vm4, %v1295_v39 }
 0x775   :  { %1800 = vmatmul.msk.f32.vlgmr.msrb.gmra.mxu2 %vm428_vm4, %v1294_v40 }
 0x77a   :  { %v1857_v42 = vpop.eup %1856 }
 0x77b   :  { %v1293_v43 = vmul.f32 %v1857_v42, %v1849_v29 }
 0x77d   :  { %1799 = vmatmul.msk.f32.vlgmr.msrb.gmra.mxu1 %vm428_vm4, %v1293_v43 }
 0x7e4   :  { %v1316_v47 = vpop.f32.mrf.mxu0 }
 0x7e5   :  { %1802 = vmatmul.msk.f32.vlgmr.msra.gmra.mxu0 %vm428_vm4, %v1316_v47 }
 0x7f7   :  { %v1385_v48 = vpop.f32.mrf.mxu3 }
 0x7f8   :  { %v1362_v49 = vpop.f32.mrf.mxu2  ;;  %1805 = vmatmul.msk.f32.vlgmr.msra.gmra.mxu3 %vm428_vm4, %v1385_v48 }
 0x7f9   :  { %1804 = vmatmul.msk.f32.vlgmr.msra.gmra.mxu2 %vm428_vm4, %v1362_v49 }
 0x7fa   :  { %v1339_v50 = vpop.f32.mrf.mxu1 }
 0x7fb   :  { %1803 = vmatmul.msk.f32.vlgmr.msra.gmra.mxu1 %vm428_vm4, %v1339_v50 }
 0x862   :  { %v1408_v51 = vpop.f32.mrf.mxu0 }
 0x863   :  { %v1480_v54 = vsel %vm45_vm0, %v1408_v51, 0.0 }
 0x878   :  { %v1431_v52 = vpop.f32.mrf.mxu1 }
 0x879   :  { %v1481_v53 = vsel %vm45_vm0, %v1431_v52, 0.0  ;;  %v43_v52 = vld [vmem:[%s2243_s5 + $0x58] sm:$0xff] }
 0x87a   :  { %v1482_v55 = vadd.f32 %v1481_v53, %v1480_v54  ;;  %v42_v53 = vld [vmem:[%s2243_s5 + $0x50] sm:$0xff]  ;;  %1629 = vmatpush.msrb.mxu1 %v43_v52 }
 0x87b   :  { %v1477_v57 = vpop.f32.mrf.mxu3 }
 0x87c   :  { %v1454_v56 = vpop.f32.mrf.mxu2  ;;  %v1485_v61 = vsel %vm45_vm0, %v1477_v57, 0.0  ;;  %1630 = vmatpush.msrb.mxu1 %v42_v53 }
 0x87d   :  { %v1483_v58 = vsel %vm45_vm0, %v1454_v56, 0.0  ;;  %v41_v56 = vld [vmem:[%s2243_s5 + $0x48] sm:$0xff] }
 0x87e   :  { %v1484_v59 = vadd.f32 %v1483_v58, %v1482_v55  ;;  %1631 = vmatpush.msrb.mxu1 %v41_v56 }
 0x880   :  { %v1486_v62 = vadd.f32 %v1485_v61, %v1484_v59 }
 0x882   :  { %v1488_v63 = vadd.f32 %v1487_v60, %v1486_v62  ;;  %v40_v60 = vld [vmem:[%s2243_s5 + $0x40] sm:$0xff] }
 0x883   :  { %1632 = vmatpush.msrb.mxu1 %v40_v60 }
 0x884   :  { %v1490_v1 = vrot.slane %v1488_v63, 1  ;;  %v1491_v2 = vrot.slane %v1488_v63, 2  ;;  %v1493_v3 = vrot.slane %v1488_v63, 4  ;;  %v1494_v4 = vrot.slane %v1488_v63, 5 }
 0x885   :  { %v1495_v5 = vrot.slane %v1488_v63, 6  ;;  %v1496_v6 = vrot.slane %v1488_v63, 7  ;;  %v1497_v7 = vperm.slane %v1488_v63, 0  ;;  %v1492_v9 = vrot.slane %v1488_v63, 3 }
 0x886   :  { %v1501_v10 = vperm.slane %v1493_v3, 0  ;;  %v1502_v11 = vperm.slane %v1494_v4, 0  ;;  %v1498_v14 = vperm.slane %v1490_v1, 0  ;;  %v1499_v15 = vperm.slane %v1491_v2, 0  ;;  %v39_v1 = vld [vmem:[%s2243_s5 + $0x38] sm:$0xff] }
 0x887   :  { %1505 = vst [vmem:[#allocation1] ss:$4 sm:$0xff] %v1497_v7  ;;  %v1503_v12 = vperm.slane %v1495_v5, 0  ;;  %v1504_v13 = vperm.slane %v1496_v6, 0  ;;  %v1500_v16 = vperm.slane %v1492_v9, 0  ;;  %1633 = vmatpush.msrb.mxu1 %v39_v1  ;;  %v1576_v6 = vperm.slane %v1950_v33, 6 }
 0x888   :  { %1513 = vst [vmem:[#allocation1 + $0x20] ss:$4 sm:$0xff] %v1501_v10  ;;  %v1866_v10 = vld [vmem:[%s2238_s6] sm:$0xff]  ;;  %v38_v33 = vld [vmem:[%s2243_s5 + $0x30] sm:$0xff] }
 0x889   :  { %1515 = vst [vmem:[#allocation1 + $0x21] ss:$4 sm:$0xff] %v1502_v11  ;;  %v1579_v11 = vperm.slane %v1866_v10, 7  ;;  %1634 = vmatpush.msrb.mxu1 %v38_v33 }
 0x88a   :  { %1517 = vst [vmem:[#allocation1 + $0x22] ss:$4 sm:$0xff] %v1503_v12 }
 0x88b   :  { %1519 = vst [vmem:[#allocation1 + $0x23] ss:$4 sm:$0xff] %v1504_v13 }
 0x88c   :  { %1507 = vst [vmem:[#allocation1 + $0x1] ss:$4 sm:$0xff] %v1498_v14 }
 0x88d   :  { %1509 = vst [vmem:[#allocation1 + $0x2] ss:$4 sm:$0xff] %v1499_v15 }
 0x88e   :  { %1511 = vst [vmem:[#allocation1 + $0x3] ss:$4 sm:$0xff] %v1500_v16 }
 0x892   :  { %v1521_v18 = vld.sshfl [vmem:[#allocation1 + $0x20] sm:$0xff pattern:$0x73625140] }
 0x893   :  { %v1525_v19 = vadd.f32 %v1521_v18, %v28_v17  ;;  %v37_v18 = vld [vmem:[%s2243_s5 + $0x28] sm:$0xff] }
 0x894   :  { %1635 = vmatpush.msrb.mxu1 %v37_v18 }
 0x895   :  { %v1529_v21 = vsel %vm45_vm0, %v1525_v19, 0.0  ;;  %v1520_v22 = vld.sshfl [vmem:[#allocation1] sm:$0xff pattern:$0x73625140] }
 0x896   :  { %1530 = vadd.xlane.f32.xlu0 %v1529_v21  ;;  %v1524_v23 = vadd.f32 %v1520_v22, %v27_v20  ;;  %v1814_v20 = vld [vmem:[%s2243_s5 + $0x60] ss:$0 sm:$0xff] }
 0x898   :  { %v1526_v24 = vsel %vm45_vm0, %v1524_v23, 0.0 }
 0x899   :  { %1527 = vadd.xlane.f32.xlu2 %v1526_v24 }
 0x909   :  { %v1531_v25 = vpop.xlane.xlu0 %1530 }
 0x90a   :  { %v1533_v26 = vmul.f32 %v1531_v25, %v1918_v8 }
 0x90c   :  { %v2172_v27 = vsub.f32 %v1525_v19, %v1533_v26  ;;  %v1528_v28 = vpop.xlane.xlu2 %1527  ;;  %v36_v19 = vld [vmem:[%s2243_s5 + $0x20] sm:$0xff] }
 0x90d   :  { %v1532_v29 = vmul.f32 %v1528_v28, %v1918_v8  ;;  %v33_v8 = vld [vmem:[%s2243_s5 + $0x8] sm:$0xff]  ;;  %1636 = vmatpush.msrb.mxu1 %v36_v19  ;;  %s1868_s5 = smov 32  }
 0x90e   :  { %v1537_v30 = vmul.f32 %v2172_v27, %v2172_v27  ;;  %1603 = vmatpush.msrb.mxu0 %v33_v8 }
 0x90f   :  { %v1534_v31 = vsub.f32 %v1524_v23, %v1532_v29 }
 0x910   :  { %v1541_v32 = vsel %vm45_vm0, %v1537_v30, 0.0  ;;  %1604 = vmatpush.msrb.mxu0 %v32_v38 }
 0x911   :  { %1542 = vadd.xlane.f32.xlu2 %v1541_v32  ;;  %v1536_v34 = vmul.f32 %v1534_v31, %v1534_v31 }
 0x913   :  { %v1538_v35 = vsel %vm45_vm0, %v1536_v34, 0.0 }
 0x914   :  { %1539 = vadd.xlane.f32.xlu1 %v1538_v35 }
 0x984   :  { %v1543_v39 = vpop.xlane.xlu2 %1542 }
 0x985   :  { %v1545_v40 = vmul.f32 0.032258064, %v1543_v39 }
 0x987   :  { %v1540_v41 = vpop.xlane.xlu1 %1539  ;;  %1858 = vrsqrt.f32 %v1545_v40  ;;  %vm1565_vm7 = vcmp.eq.f32.partialorder %v1545_v40, inf  ;;  %v1568_v59 = vand.u32 2147483648, %v1545_v40  ;;  %vm1567_vm8 = vcmp.eq.f32.partialorder %v1545_v40, 0.0 }
 0x988   :  { %v1544_v42 = vmul.f32 0.032258064, %v1540_v41 }
 0x98a   :  { %1860 = vrsqrt.f32 %v1544_v42  ;;  %vm1553_vm9 = vcmp.eq.f32.partialorder %v1544_v42, inf  ;;  %v1556_v62 = vand.u32 2147483648, %v1544_v42  ;;  %vm1555_vm10 = vcmp.eq.f32.partialorder %v1544_v42, 0.0 }
 0x98d   :  { %v1859_v43 = vpop.eup %1858 }
 0x98e   :  { %v1559_v44 = vmul.f32 %v1859_v43, %v1545_v40 }
 0x990   :  { %v1861_v45 = vpop.eup %1860  ;;  %v1560_v0 = vmul.f32 %v1859_v43, %v1559_v44 }
 0x991   :  { %v1547_v46 = vmul.f32 %v1861_v45, %v1544_v42 }
 0x992   :  { %v1561_v47 = vmul.f32 0.5, %v1560_v0 }
 0x993   :  { %v1548_v48 = vmul.f32 %v1861_v45, %v1547_v46 }
 0x994   :  { %v1562_v49 = vsub.f32 1.5, %v1561_v47 }
 0x995   :  { %v1549_v50 = vmul.f32 0.5, %v1548_v48 }
 0x996   :  { %v1563_v51 = vmul.f32 %v1859_v43, %v1562_v49 }
 0x997   :  { %v1550_v54 = vsub.f32 1.5, %v1549_v50 }
 0x998   :  { %v1564_v55 = vmul.f32 %v1563_v51, %v1545_v40 }
 0x999   :  { %v1551_v57 = vmul.f32 %v1861_v45, %v1550_v54 }
 0x99a   :  { %v1566_v58 = vsel %vm1565_vm7, %v1545_v40, %v1564_v55 }
 0x99b   :  { %v1552_v61 = vmul.f32 %v1551_v57, %v1544_v42  ;;  %v1569_v63 = vsel %vm1567_vm8, %v1568_v59, %v1566_v58 }
 0x99c   :  { %v1571_v5 = vadd.f32 1e-06, %v1569_v63 }
 0x99d   :  { %v1554_v2 = vsel %vm1553_vm9, %v1544_v42, %v1552_v61 }
 0x99e   :  { %v1557_v3 = vsel %vm1555_vm10, %v1556_v62, %v1554_v2 }
 0x99f   :  { %v1570_v4 = vadd.f32 1e-06, %v1557_v3 }
 0x9a1   :  { %1862 = vrcp.f32 %v1570_v4 }
 0x9a2   :  { %1864 = vrcp.f32 %v1571_v5 }
 0x9a7   :  { %v1863_v7 = vpop.eup %1862 }
 0x9a8   :  { %v1574_v9 = vmul.f32 %v1863_v7, %v1534_v31  ;;  %v1865_v12 = vpop.eup %1864 }
 0x9a9   :  { %v1575_v15 = vmul.f32 %v1865_v12, %v2172_v27  ;;  %v1815_v27 = vld [vmem:[%s2238_s6 + $0x8] ss:$0 sm:$0xff] }
 0x9aa   :  { %v1577_v13 = vmul.f32 %v1576_v6, %v1574_v9 }
 0x9ab   :  { %v1578_v16 = vmul.f32 %v1576_v6, %v1575_v15 }
 0x9ac   :  { %v1580_v14 = vadd.f32 %v1579_v11, %v1577_v13 }
 0x9ad   :  { %v1581_v17 = vadd.f32 %v1579_v11, %v1578_v16 }
 0x9ae   :  { %1806 = vmatmul.msk.f32.vlgmr.msrb.gmra.mxu0 %vm45_vm0, %v1580_v14 }
 0x9b6   :  { %1807 = vmatmul.msk.f32.gmra.mxu0 %vm45_vm0, %v1581_v17 }
 0xa2b   :  { %v1606_v21 = vpop.f32.mrf.mxu0 }
 0xa2c   :  { %v1607_v22 = vadd.f32 %v1814_v20, %v1606_v21 }
 0xa2e   :  { %v1612_v23 = vmax.f32 %v1607_v22, 0.0 }
 0xa30   :  { %1808 = vmatmul.msk.f32.vlgmr.msrb.gmra.mxu1 %vm1614_vm11, %v1612_v23 }
 0xa33   :  { %v1609_v24 = vpop.f32.mrf.mxu0 }
 0xa34   :  { %v1610_v25 = vadd.f32 %v1814_v20, %v1609_v24 }
 0xa36   :  { %v1613_v26 = vmax.f32 %v1610_v25, 0.0 }
 0xa38   :  { %1809 = vmatmul.msk.f32.gmra.mxu1 %vm1614_vm11, %v1613_v26 }
 0xaad   :  { %v1638_v28 = vpop.f32.mrf.mxu1 }
 0xaae   :  { %v1644_v29 = vadd.f32 %v1638_v28, %v1580_v14 }
 0xab0   :  { %v1647_v30 = vadd.f32 %v1815_v27, %v1644_v29 }
 0xab2   :  { %v1650_v31 = vrot.slane %v1647_v30, 2  ;;  %v1654_v36 = vrot.slane %v1647_v30, 4  ;;  %v1658_v38 = vrot.slane %v1647_v30, 6 }
 0xab4   :  { %1651 = vrot.lane.b32.xlu2 %v1650_v31, %s1868_s5 }
 0xab5   :  { %v1641_v32 = vpop.f32.mrf.mxu1 }
 0xab6   :  { %v1645_v34 = vadd.f32 %v1641_v32, %v1581_v17 }
 0xab8   :  { %v1648_v35 = vadd.f32 %v1815_v27, %v1645_v34 }
 0xaba   :  { %v1667_v37 = vrot.slane %v1648_v35, 4  ;;  %v1663_v8 = vrot.slane %v1648_v35, 2  ;;  %v1671_v39 = vrot.slane %v1648_v35, 6 }
 0xabc   :  { %1655 = vrot.lane.b32.xlu2 %v1654_v36, %s1869_s12  ;;  %1668 = vrot.lane.b32.xlu1 %v1667_v37, %s1869_s12 }
 0xabd   :  { %1664 = vrot.lane.b32.xlu0 %v1663_v8, %s1868_s5 }
 0xac4   :  { %1659 = vrot.lane.b32.xlu1 %v1658_v38, %s1870_s13 }
 0xac5   :  { %1672 = vrot.lane.b32.xlu0 %v1671_v39, %s1870_s13 }
 0xb0e   :  { %v1652_v40 = vpop.permute.xlu2 %1651 }
 0xb0f   :  { %v1675_v47 = vsel %vm45_vm0, %v1647_v30, %v1652_v40 }
 0xb16   :  { %v1656_v44 = vpop.permute.xlu2 %1655 }
 0xb17   :  { %v1676_v49 = vsel %vm1614_vm11, %v1675_v47, %v1656_v44 }
 0xb2e   :  { %v1669_v41 = vpop.permute.xlu1 %1668 }
 0xb2f   :  { %v1665_v42 = vpop.permute.xlu0 %1664 }
 0xb30   :  { %v1679_v43 = vsel %vm45_vm0, %v1648_v35, %v1665_v42 }
 0xb31   :  { %v1680_v0 = vsel %vm1614_vm11, %v1679_v43, %v1669_v41 }
 0xb36   :  { %v1660_v45 = vpop.permute.xlu1 %1659 }
 0xb37   :  { %v1673_v46 = vpop.permute.xlu0 %1672  ;;  %v1678_v51 = vsel %vm1677_vm12, %v1676_v49, %v1660_v45 }
 0xb38   :  { %v1681_v48 = vsel %vm1677_vm12, %v1680_v0, %v1673_v46 }
 0xb39   :  { %v1684_v50 = vrot.slane %v1681_v48, 6 }
 0xb3b   :  { %v1686_v52 = vsel %vm1685_vm13, %v1678_v51, %v1684_v50 }
 0xb3c   :  { %1688 = vst [vmem:[%s2244_s7] sm:$0xf] %v1686_v52 }

</bundles_post_ra>
